<compile_context>
chip_gen: v7x
topology: tpu7x:2x2x1
jax: 0.10.0
libtpu: 0.0.40
codegen_flags: <defaults>
</compile_context>

<pallas_src>
import jax
import jax.numpy as jnp
from jax import lax
from jax.experimental import pallas as pl
from jax.experimental.pallas import tpu as pltpu


def scaling_encoder_kernel(maxlen_ref, xs_ref, len_ref, wih_ref, whh_ref, b_ref,
                           z_ref, h_ref, c_ref, xw_sc):
    """One (batch-block, time-tile) step of the LSTM recurrence with length masking.

    maxlen_ref: (1,)          i32  SMEM scalar-prefetch: max(lengths)
    xs_ref    : (Tt, Bb)      f32  time-major input tile (lane-dense over batch)
    len_ref   : (Bb, 1)       i32  per-sequence valid lengths
    wih_ref   : (1, 4H)       f32  W_ih^T   (PyTorch gate order i, f, g, o)
    whh_ref   : (H, 4H)       f32  W_hh^T
    b_ref     : (1, 4H)       f32  b_ih + b_hh
    z_ref     : (Tt, Bb, H)   f32  masked LSTM outputs (fc applied in wrapper)
    h_ref     : (Bb, H)       f32  final hidden state (also the cross-tile carry)
    c_ref     : (Bb, H)       f32  final cell state   (also the cross-tile carry)
    xw_sc     : (Tt, Bb, 4H)  f32  per-tile precomputed x*W_ih + b
    """
    Tt, Bb = xs_ref.shape
    H = whh_ref.shape[0]
    t_blk = pl.program_id(1)
    t0 = t_blk * Tt
    max_len = maxlen_ref[0]

    @pl.when(t_blk == 0)
    def _init():
        # PyTorch default zero initial state when no (h0, c0) is given.
        h_ref[...] = jnp.zeros_like(h_ref)
        c_ref[...] = jnp.zeros_like(c_ref)

    @pl.when(t0 >= max_len)
    def _skip():
        # Tile is entirely past every sequence's length: z is zero, state unchanged.
        z_ref[...] = jnp.zeros_like(z_ref)

    @pl.when(t0 < max_len)
    def _active():
        # Precompute the input projection + bias for the whole tile (parallel, fully
        # overlappable) so it is off the serial h->h critical path.
        xw_sc[...] = xs_ref[...][:, :, None] * wih_ref[...] + b_ref[...]

        w_hh = whh_ref[...]                 # (H, 4H), hoisted
        lengths = len_ref[...]              # (Bb, 1) int32, hoisted

        def step(tt, carry):
            h, c = carry                                            # (Bb, H) each, in vregs
            gates = (jnp.dot(h, w_hh, preferred_element_type=jnp.float32)
                     + xw_sc[tt])                                   # (Bb, 4H)

            i = jax.nn.sigmoid(gates[:, 0 * H:1 * H])
            f = jax.nn.sigmoid(gates[:, 1 * H:2 * H])
            g = jnp.tanh(gates[:, 2 * H:3 * H])
            o = jax.nn.sigmoid(gates[:, 3 * H:4 * H])

            c_new = f * c + i * g
            h_new = o * jnp.tanh(c_new)

            mask = (t0 + tt) < lengths                              # (Bb, 1) bool
            h = jnp.where(mask, h_new, h)                           # freeze past length
            c = jnp.where(mask, c_new, c)

            # pad_packed_sequence: zeros for t >= length (fc applied later).
            z_ref[tt] = jnp.where(mask, h_new, 0.0)                 # (Bb, H)
            return h, c

        h, c = lax.fori_loop(0, Tt, step, (h_ref[...], c_ref[...]),
                             unroll=min(8, Tt))

        # One state write per grid step; h_ref/c_ref ARE the cross-tile carry.
        h_ref[...] = h
        c_ref[...] = c


def scaling_encoder(x, lengths, params, custom_pad_length=None,
                    time_tile=128, batch_tile=None):
    """x: (B, T) f32, lengths: (B,) int -> (z (B, pad_len, H), (h (1,B,H), c (1,B,H)))."""
    w_ih_t, w_hh_t, b, w_fc_t, b_fc = params
    B, T = x.shape
    H = w_hh_t.shape[0]

    # Time tile must be a multiple of 8 (sublane) for the lane-dense (Tt, Bb) xs block.
    Tt = max(8, min(time_tile, T))
    Tt = ((Tt + 7) // 8) * 8
    n_tblk = -(-T // Tt)                       # ceil div
    T_pad = n_tblk * Tt

    # Batch blocking (v7x megacore): only when it keeps blocks lane/sublane aligned.
    if batch_tile is not None and batch_tile % 128 == 0 and B % batch_tile == 0:
        Bb = batch_tile
    else:
        Bb = B
    n_bblk = B // Bb

    if T_pad > T:
        # Extra timesteps are masked out (t >= lengths), so zero-padding is safe.
        x = jnp.pad(x, ((0, 0), (0, T_pad - T)))
    xs = jnp.transpose(x, (1, 0)).astype(jnp.float32)          # (T_pad, B), lane-dense
    len2d = lengths.astype(jnp.int32)[:, None]                 # (B, 1)
    max_len = jnp.max(lengths).astype(jnp.int32)[None]         # (1,) scalar prefetch

    z_tm, h_n, c_n = pl.pallas_call(
        scaling_encoder_kernel,
        out_shape=(
            jax.ShapeDtypeStruct((T_pad, B, H), jnp.float32),
            jax.ShapeDtypeStruct((B, H), jnp.float32),
            jax.ShapeDtypeStruct((B, H), jnp.float32),
        ),
        grid_spec=pltpu.PrefetchScalarGridSpec(
            num_scalar_prefetch=1,                             # max(lengths) -> SMEM
            grid=(n_bblk, n_tblk),                             # (batch parallel, time serial)
            in_specs=[
                pl.BlockSpec((Tt, Bb), lambda bb, t, ml: (t, bb)),      # xs, streamed
                pl.BlockSpec((Bb, 1), lambda bb, t, ml: (bb, 0)),       # lengths
                pl.BlockSpec((1, 4 * H), lambda bb, t, ml: (0, 0)),     # W_ih^T
                pl.BlockSpec((H, 4 * H), lambda bb, t, ml: (0, 0)),     # W_hh^T
                pl.BlockSpec((1, 4 * H), lambda bb, t, ml: (0, 0)),     # bias
            ],
            out_specs=(
                pl.BlockSpec((Tt, Bb, H), lambda bb, t, ml: (t, bb, 0)),  # z, streamed
                pl.BlockSpec((Bb, H), lambda bb, t, ml: (bb, 0)),         # h_n (resident carry)
                pl.BlockSpec((Bb, H), lambda bb, t, ml: (bb, 0)),         # c_n (resident carry)
            ),
            scratch_shapes=[pltpu.VMEM((Tt, Bb, 4 * H), jnp.float32)],   # per-tile x*W_ih + b
        ),
        compiler_params=pltpu.CompilerParams(
            dimension_semantics=("parallel", "arbitrary"),     # batch parallel, T is a true recurrence
            # Size Tt so 2*Tt*Bb*H*4 (z double-buffer) + Tt*Bb*4H*4 (xw scratch) fits comfortably;
            # 32 MiB leaves headroom even on v7x's 64 MiB physical VMEM.
            vmem_limit_bytes=32 * 1024 * 1024,
        ),
    )(max_len, xs, len2d, w_ih_t, w_hh_t, b)

    # fc hoisted out of the recurrence: one big (T*B, H) x (H, H) GEMM that also absorbs the
    # (T, B, H) -> (B, T, H) transpose.  Padded positions are zero before fc -> bias rows after
    # fc (matches pad_packed_sequence + Linear).
    z_tm = z_tm[:T]
    z = jnp.einsum('tbh,hk->btk', z_tm, w_fc_t,
                   preferred_element_type=jnp.float32) + b_fc          # (B, T, H)

    # TODO(synk): with custom_pad_length=None PyTorch would emit max(lengths) timesteps (dynamic);
    # JAX needs a static shape, so we use T instead (extra rows are fc-bias rows, like padding).
    pad_len = T if custom_pad_length is None else custom_pad_length
    if pad_len > T:
        tail = jnp.broadcast_to(b_fc[None, :, :], (B, pad_len - T, H))
        z = jnp.concatenate([z, tail], axis=1)
    return z, (h_n[None], c_n[None])


def init_params(key, hidden_dim):
    """Deterministic init mimicking nn.LSTM / nn.Linear default uniform(-k, k)."""
    H = hidden_dim
    k = 1.0 / float(H) ** 0.5
    ks = jax.random.split(key, 6)
    w_ih = jax.random.uniform(ks[0], (4 * H, 1), jnp.float32, -k, k)
    w_hh = jax.random.uniform(ks[1], (4 * H, H), jnp.float32, -k, k)
    b_ih = jax.random.uniform(ks[2], (4 * H,), jnp.float32, -k, k)
    b_hh = jax.random.uniform(ks[3], (4 * H,), jnp.float32, -k, k)
    w_fc = jax.random.uniform(ks[4], (H, H), jnp.float32, -k, k)
    b_fc = jax.random.uniform(ks[5], (H,), jnp.float32, -k, k)
    return (w_ih.T, w_hh.T, (b_ih + b_hh)[None, :], w_fc.T, b_fc[None, :])


def reference(x, lengths, params):
    """Pure-JAX reference of the PyTorch forward semantics."""
    w_ih_t, w_hh_t, b, w_fc_t, b_fc = params
    B, T = x.shape
    H = w_hh_t.shape[0]
    h = jnp.zeros((B, H), jnp.float32)
    c = jnp.zeros((B, H), jnp.float32)
    zs = []
    for t in range(T):
        x_t = x[:, t:t + 1]
        gates = x_t @ w_ih_t + h @ w_hh_t + b
        i = jax.nn.sigmoid(gates[:, :H])
        f = jax.nn.sigmoid(gates[:, H:2 * H])
        g = jnp.tanh(gates[:, 2 * H:3 * H])
        o = jax.nn.sigmoid(gates[:, 3 * H:])
        c_new = f * c + i * g
        h_new = o * jnp.tanh(c_new)
        mask = (t < lengths)[:, None]
        h = jnp.where(mask, h_new, h)
        c = jnp.where(mask, c_new, c)
        zs.append(jnp.where(mask, h_new, 0.0))
    z = jnp.stack(zs, axis=1) @ w_fc_t + b_fc
    return z, (h[None], c[None])


if __name__ == "__main__":
    B, T, H = 2, 24, 32                     # batch=2, seq=24, hidden=32
    key = jax.random.PRNGKey(0)
    kx, kp = jax.random.split(key)
    x = jax.random.normal(kx, (B, T), jnp.float32)      # (B, T) before unsqueeze(-1)
    lengths = jnp.array([13, 7], dtype=jnp.int32)       # valid lengths per sequence
    params = init_params(kp, H)

    # time_tile=8 -> 3 time tiles: exercises the cross-tile state carry AND the
    # fully-masked-tile skip path (last tile has t0=16 >= max(lengths)=13).
    out = scaling_encoder(x, lengths, params, custom_pad_length=T, time_tile=8)
    out = jax.block_until_ready(out)
    z, (h_n, c_n) = out

    z_ref, (h_ref, c_ref) = reference(x, lengths, params)
    assert z.shape == (B, T, H) and h_n.shape == (1, B, H) and c_n.shape == (1, B, H)
    assert jnp.allclose(z, z_ref, atol=1e-5, rtol=1e-5)
    assert jnp.allclose(h_n, h_ref, atol=1e-5, rtol=1e-5)
    assert jnp.allclose(c_n, c_ref, atol=1e-5, rtol=1e-5)
    print("KERNEL_OK")
</pallas_src>

<mosaic_0001>
module attributes {stable_mosaic.version = 11 : i64} {
  func.func @scaling_encoder_kernel(%arg0: i32, %arg1: i32, %arg2: memref<1xi32, #tpu.memory_space<smem>>, %arg3: memref<8x2xf32, #tpu.memory_space<vmem>>, %arg4: memref<2x1xi32, #tpu.memory_space<vmem>>, %arg5: memref<1x128xf32, #tpu.memory_space<vmem>>, %arg6: memref<32x128xf32, #tpu.memory_space<vmem>>, %arg7: memref<1x128xf32, #tpu.memory_space<vmem>>, %arg8: memref<8x2x32xf32, #tpu.memory_space<vmem>>, %arg9: memref<2x32xf32, #tpu.memory_space<vmem>>, %arg10: memref<2x32xf32, #tpu.memory_space<vmem>>, %arg11: memref<8x2x128xf32, #tpu.memory_space<vmem>>) attributes {dimension_semantics = [#tpu.dimension_semantics<parallel>, #tpu.dimension_semantics<arbitrary>], iteration_bounds = array<i64: 1, 3>, scalar_prefetch = 1 : i64, scratch_operands = 1 : i64, tpu.core_type = #tpu.core_type<tc>, window_params = [{transform_indices = @transform_0, window_bounds = array<i64: 8, 2>}, {transform_indices = @transform_1, window_bounds = array<i64: 2, 1>}, {pipeline_mode = #tpu.pipeline_mode<synchronous>, transform_indices = @transform_2, window_bounds = array<i64: 1, 128>}, {pipeline_mode = #tpu.pipeline_mode<synchronous>, transform_indices = @transform_3, window_bounds = array<i64: 32, 128>}, {pipeline_mode = #tpu.pipeline_mode<synchronous>, transform_indices = @transform_4, window_bounds = array<i64: 1, 128>}, {transform_indices = @transform_5, window_bounds = array<i64: 8, 2, 32>}, {transform_indices = @transform_6, window_bounds = array<i64: 2, 32>}, {transform_indices = @transform_7, window_bounds = array<i64: 2, 32>}]} {
    %c8_i32 = arith.constant 8 : i32
    %0 = arith.muli %arg1, %c8_i32 : i32
    %c0 = arith.constant 0 : index
    %1 = memref.load %arg2[%c0] : memref<1xi32, #tpu.memory_space<smem>>
    %c0_i32 = arith.constant 0 : i32
    %2 = arith.cmpi eq, %arg1, %c0_i32 : i32
    %3 = arith.extui %2 : i1 to i32
    %c0_i32_0 = arith.constant 0 : i32
    %4 = arith.cmpi ne, %3, %c0_i32_0 : i32
    scf.if %4 {
      %cst = arith.constant 0.000000e+00 : f32
      %11 = vector.broadcast %cst : f32 to vector<2x32xf32>
      %c0_3 = arith.constant 0 : index
      %c0_4 = arith.constant 0 : index
      %12 = vector.load %arg9[%c0_3, %c0_4] : memref<2x32xf32, #tpu.memory_space<vmem>>, vector<2x32xf32>
      tpu.vector_store %arg9[%c0_3, %c0_4], %11 {strides = array<i32>} : memref<2x32xf32, #tpu.memory_space<vmem>>, vector<2x32xf32>,
      %cst_5 = arith.constant 0.000000e+00 : f32
      %13 = vector.broadcast %cst_5 : f32 to vector<2x32xf32>
      %c0_6 = arith.constant 0 : index
      %c0_7 = arith.constant 0 : index
      %14 = vector.load %arg10[%c0_6, %c0_7] : memref<2x32xf32, #tpu.memory_space<vmem>>, vector<2x32xf32>
      tpu.vector_store %arg10[%c0_6, %c0_7], %13 {strides = array<i32>} : memref<2x32xf32, #tpu.memory_space<vmem>>, vector<2x32xf32>,
    } else {
    }
    %5 = arith.cmpi sge, %0, %1 : i32
    %6 = arith.extui %5 : i1 to i32
    %c0_i32_1 = arith.constant 0 : i32
    %7 = arith.cmpi ne, %6, %c0_i32_1 : i32
    scf.if %7 {
      %cst = arith.constant 0.000000e+00 : f32
      %11 = vector.broadcast %cst : f32 to vector<8x2x32xf32>
      %c0_3 = arith.constant 0 : index
      %c0_4 = arith.constant 0 : index
      %c0_5 = arith.constant 0 : index
      %12 = vector.load %arg8[%c0_3, %c0_4, %c0_5] : memref<8x2x32xf32, #tpu.memory_space<vmem>>, vector<8x2x32xf32>
      tpu.vector_store %arg8[%c0_3, %c0_4, %c0_5], %11 {strides = array<i32>} : memref<8x2x32xf32, #tpu.memory_space<vmem>>, vector<8x2x32xf32>,
    } else {
    }
    %8 = arith.cmpi slt, %0, %1 : i32
    %9 = arith.extui %8 : i1 to i32
    %c0_i32_2 = arith.constant 0 : i32
    %10 = arith.cmpi ne, %9, %c0_i32_2 : i32
    scf.if %10 {
      %c0_3 = arith.constant 0 : index
      %c0_4 = arith.constant 0 : index
      %11 = vector.load %arg3[%c0_3, %c0_4] : memref<8x2xf32, #tpu.memory_space<vmem>>, vector<8x2xf32>
      %12 = vector.shape_cast %11 : vector<8x2xf32> to vector<8x2x1xf32>
      %c0_5 = arith.constant 0 : index
      %c0_6 = arith.constant 0 : index
      %13 = vector.load %arg5[%c0_5, %c0_6] : memref<1x128xf32, #tpu.memory_space<vmem>>, vector<1x128xf32>
      %14 = vector.shape_cast %13 : vector<1x128xf32> to vector<1x1x128xf32>
      %15 = vector.broadcast %12 : vector<8x2x1xf32> to vector<8x2x128xf32>
      %16 = vector.broadcast %14 : vector<1x1x128xf32> to vector<8x2x128xf32>
      %17 = arith.mulf %15, %16 : vector<8x2x128xf32>
      %c0_7 = arith.constant 0 : index
      %c0_8 = arith.constant 0 : index
      %18 = vector.load %arg7[%c0_7, %c0_8] : memref<1x128xf32, #tpu.memory_space<vmem>>, vector<1x128xf32>
      %19 = vector.shape_cast %18 : vector<1x128xf32> to vector<1x1x128xf32>
      %20 = vector.broadcast %19 : vector<1x1x128xf32> to vector<8x2x128xf32>
      %21 = arith.addf %17, %20 : vector<8x2x128xf32>
      %c0_9 = arith.constant 0 : index
      %c0_10 = arith.constant 0 : index
      %c0_11 = arith.constant 0 : index
      %22 = vector.load %arg11[%c0_9, %c0_10, %c0_11] : memref<8x2x128xf32, #tpu.memory_space<vmem>>, vector<8x2x128xf32>
      tpu.vector_store %arg11[%c0_9, %c0_10, %c0_11], %21 {strides = array<i32>} : memref<8x2x128xf32, #tpu.memory_space<vmem>>, vector<8x2x128xf32>,
      %c0_12 = arith.constant 0 : index
      %c0_13 = arith.constant 0 : index
      %23 = vector.load %arg6[%c0_12, %c0_13] : memref<32x128xf32, #tpu.memory_space<vmem>>, vector<32x128xf32>
      %c0_14 = arith.constant 0 : index
      %c0_15 = arith.constant 0 : index
      %24 = vector.load %arg4[%c0_14, %c0_15] : memref<2x1xi32, #tpu.memory_space<vmem>>, vector<2x1xi32>
      %c0_16 = arith.constant 0 : index
      %c0_17 = arith.constant 0 : index
      %25 = vector.load %arg9[%c0_16, %c0_17] : memref<2x32xf32, #tpu.memory_space<vmem>>, vector<2x32xf32>
      %c0_18 = arith.constant 0 : index
      %c0_19 = arith.constant 0 : index
      %26 = vector.load %arg10[%c0_18, %c0_19] : memref<2x32xf32, #tpu.memory_space<vmem>>, vector<2x32xf32>
      %c0_i32_20 = arith.constant 0 : i32
      %cst = arith.constant dense<0.000000e+00> : vector<2x128xf32>
      %27 = tpu.matmul %25, %23, %cst {dimension_numbers = #tpu.dot_dimension_numbers<[1], [0], [0], [1], [0, 0, 1, 1], [], []>} : vector<2x32xf32>, vector<32x128xf32>, vector<2x128xf32> -> vector<2x128xf32>
      %28 = arith.index_cast %c0_i32_20 : i32 to index
      %c0_21 = arith.constant 0 : index
      %c0_22 = arith.constant 0 : index
      %29 = vector.load %arg11[%28, %c0_21, %c0_22] : memref<8x2x128xf32, #tpu.memory_space<vmem>>, vector<1x2x128xf32>
      %30 = vector.shape_cast %29 : vector<1x2x128xf32> to vector<2x128xf32>
      %31 = arith.addf %27, %30 : vector<2x128xf32>
      %32 = vector.extract_strided_slice %31 {offsets = [0, 0], sizes = [2, 32], strides = [1, 1]} : vector<2x128xf32> to vector<2x32xf32>
      %33 = arith.negf %32 : vector<2x32xf32>
      %34 = math.exp %33 : vector<2x32xf32>
      %cst_23 = arith.constant 1.000000e+00 : f32
      %35 = vector.broadcast %cst_23 : f32 to vector<2x32xf32>
      %36 = arith.addf %35, %34 : vector<2x32xf32>
      %37 = arith.divf %35, %36 : vector<2x32xf32>
      %38 = vector.extract_strided_slice %31 {offsets = [0, 32], sizes = [2, 32], strides = [1, 1]} : vector<2x128xf32> to vector<2x32xf32>
      %39 = arith.negf %38 : vector<2x32xf32>
      %40 = math.exp %39 : vector<2x32xf32>
      %cst_24 = arith.constant 1.000000e+00 : f32
      %41 = vector.broadcast %cst_24 : f32 to vector<2x32xf32>
      %42 = arith.addf %41, %40 : vector<2x32xf32>
      %43 = arith.divf %41, %42 : vector<2x32xf32>
      %44 = vector.extract_strided_slice %31 {offsets = [0, 64], sizes = [2, 32], strides = [1, 1]} : vector<2x128xf32> to vector<2x32xf32>
      %45 = math.tanh %44 : vector<2x32xf32>
      %46 = vector.extract_strided_slice %31 {offsets = [0, 96], sizes = [2, 32], strides = [1, 1]} : vector<2x128xf32> to vector<2x32xf32>
      %47 = arith.negf %46 : vector<2x32xf32>
      %48 = math.exp %47 : vector<2x32xf32>
      %cst_25 = arith.constant 1.000000e+00 : f32
      %49 = vector.broadcast %cst_25 : f32 to vector<2x32xf32>
      %50 = arith.addf %49, %48 : vector<2x32xf32>
      %51 = arith.divf %49, %50 : vector<2x32xf32>
      %52 = arith.mulf %43, %26 : vector<2x32xf32>
      %53 = arith.mulf %37, %45 : vector<2x32xf32>
      %54 = arith.addf %52, %53 : vector<2x32xf32>
      %55 = math.tanh %54 : vector<2x32xf32>
      %56 = arith.mulf %51, %55 : vector<2x32xf32>
      %57 = arith.addi %0, %c0_i32_20 : i32
      %58 = vector.broadcast %57 : i32 to vector<2x1xi32>
      %59 = arith.cmpi slt, %58, %24 : vector<2x1xi32>
      %60 = vector.shape_cast %59 : vector<2x1xi1> to vector<2x1xi1>
      %61 = vector.broadcast %60 : vector<2x1xi1> to vector<2x32xi1>
      %62 = arith.select %61, %56, %25 : vector<2x32xi1>, vector<2x32xf32>
      %63 = vector.shape_cast %59 : vector<2x1xi1> to vector<2x1xi1>
      %64 = vector.broadcast %63 : vector<2x1xi1> to vector<2x32xi1>
      %65 = arith.select %64, %54, %26 : vector<2x32xi1>, vector<2x32xf32>
      %cst_26 = arith.constant 0.000000e+00 : f32
      %66 = vector.shape_cast %59 : vector<2x1xi1> to vector<2x1xi1>
      %67 = vector.broadcast %66 : vector<2x1xi1> to vector<2x32xi1>
      %68 = vector.broadcast %cst_26 : f32 to vector<2x32xf32>
      %69 = arith.select %67, %56, %68 : vector<2x32xi1>, vector<2x32xf32>
      %70 = arith.index_cast %c0_i32_20 : i32 to index
      %c0_27 = arith.constant 0 : index
      %c0_28 = arith.constant 0 : index
      %71 = vector.load %arg8[%70, %c0_27, %c0_28] : memref<8x2x32xf32, #tpu.memory_space<vmem>>, vector<1x2x32xf32>
      %72 = vector.shape_cast %71 : vector<1x2x32xf32> to vector<2x32xf32>
      %73 = vector.shape_cast %69 : vector<2x32xf32> to vector<1x2x32xf32>
      tpu.vector_store %arg8[%70, %c0_27, %c0_28], %73 {strides = array<i32>} : memref<8x2x32xf32, #tpu.memory_space<vmem>>, vector<1x2x32xf32>,
      %c1_i32 = arith.constant 1 : i32
      %cst_29 = arith.constant dense<0.000000e+00> : vector<2x128xf32>
      %74 = tpu.matmul %62, %23, %cst_29 {dimension_numbers = #tpu.dot_dimension_numbers<[1], [0], [0], [1], [0, 0, 1, 1], [], []>} : vector<2x32xf32>, vector<32x128xf32>, vector<2x128xf32> -> vector<2x128xf32>
      %75 = arith.index_cast %c1_i32 : i32 to index
      %c0_30 = arith.constant 0 : index
      %c0_31 = arith.constant 0 : index
      %76 = vector.load %arg11[%75, %c0_30, %c0_31] : memref<8x2x128xf32, #tpu.memory_space<vmem>>, vector<1x2x128xf32>
      %77 = vector.shape_cast %76 : vector<1x2x128xf32> to vector<2x128xf32>
      %78 = arith.addf %74, %77 : vector<2x128xf32>
      %79 = vector.extract_strided_slice %78 {offsets = [0, 0], sizes = [2, 32], strides = [1, 1]} : vector<2x128xf32> to vector<2x32xf32>
      %80 = arith.negf %79 : vector<2x32xf32>
      %81 = math.exp %80 : vector<2x32xf32>
      %cst_32 = arith.constant 1.000000e+00 : f32
      %82 = vector.broadcast %cst_32 : f32 to vector<2x32xf32>
      %83 = arith.addf %82, %81 : vector<2x32xf32>
      %84 = arith.divf %82, %83 : vector<2x32xf32>
      %85 = vector.extract_strided_slice %78 {offsets = [0, 32], sizes = [2, 32], strides = [1, 1]} : vector<2x128xf32> to vector<2x32xf32>
      %86 = arith.negf %85 : vector<2x32xf32>
      %87 = math.exp %86 : vector<2x32xf32>
      %cst_33 = arith.constant 1.000000e+00 : f32
      %88 = vector.broadcast %cst_33 : f32 to vector<2x32xf32>
      %89 = arith.addf %88, %87 : vector<2x32xf32>
      %90 = arith.divf %88, %89 : vector<2x32xf32>
      %91 = vector.extract_strided_slice %78 {offsets = [0, 64], sizes = [2, 32], strides = [1, 1]} : vector<2x128xf32> to vector<2x32xf32>
      %92 = math.tanh %91 : vector<2x32xf32>
      %93 = vector.extract_strided_slice %78 {offsets = [0, 96], sizes = [2, 32], strides = [1, 1]} : vector<2x128xf32> to vector<2x32xf32>
      %94 = arith.negf %93 : vector<2x32xf32>
      %95 = math.exp %94 : vector<2x32xf32>
      %cst_34 = arith.constant 1.000000e+00 : f32
      %96 = vector.broadcast %cst_34 : f32 to vector<2x32xf32>
      %97 = arith.addf %96, %95 : vector<2x32xf32>
      %98 = arith.divf %96, %97 : vector<2x32xf32>
      %99 = arith.mulf %90, %65 : vector<2x32xf32>
      %100 = arith.mulf %84, %92 : vector<2x32xf32>
      %101 = arith.addf %99, %100 : vector<2x32xf32>
      %102 = math.tanh %101 : vector<2x32xf32>
      %103 = arith.mulf %98, %102 : vector<2x32xf32>
      %104 = arith.addi %0, %c1_i32 : i32
      %105 = vector.broadcast %104 : i32 to vector<2x1xi32>
      %106 = arith.cmpi slt, %105, %24 : vector<2x1xi32>
      %107 = vector.shape_cast %106 : vector<2x1xi1> to vector<2x1xi1>
      %108 = vector.broadcast %107 : vector<2x1xi1> to vector<2x32xi1>
      %109 = arith.select %108, %103, %62 : vector<2x32xi1>, vector<2x32xf32>
      %110 = vector.shape_cast %106 : vector<2x1xi1> to vector<2x1xi1>
      %111 = vector.broadcast %110 : vector<2x1xi1> to vector<2x32xi1>
      %112 = arith.select %111, %101, %65 : vector<2x32xi1>, vector<2x32xf32>
      %cst_35 = arith.constant 0.000000e+00 : f32
      %113 = vector.shape_cast %106 : vector<2x1xi1> to vector<2x1xi1>
      %114 = vector.broadcast %113 : vector<2x1xi1> to vector<2x32xi1>
      %115 = vector.broadcast %cst_35 : f32 to vector<2x32xf32>
      %116 = arith.select %114, %103, %115 : vector<2x32xi1>, vector<2x32xf32>
      %117 = arith.index_cast %c1_i32 : i32 to index
      %c0_36 = arith.constant 0 : index
      %c0_37 = arith.constant 0 : index
      %118 = vector.load %arg8[%117, %c0_36, %c0_37] : memref<8x2x32xf32, #tpu.memory_space<vmem>>, vector<1x2x32xf32>
      %119 = vector.shape_cast %118 : vector<1x2x32xf32> to vector<2x32xf32>
      %120 = vector.shape_cast %116 : vector<2x32xf32> to vector<1x2x32xf32>
      tpu.vector_store %arg8[%117, %c0_36, %c0_37], %120 {strides = array<i32>} : memref<8x2x32xf32, #tpu.memory_space<vmem>>, vector<1x2x32xf32>,
      %c2_i32 = arith.constant 2 : i32
      %cst_38 = arith.constant dense<0.000000e+00> : vector<2x128xf32>
      %121 = tpu.matmul %109, %23, %cst_38 {dimension_numbers = #tpu.dot_dimension_numbers<[1], [0], [0], [1], [0, 0, 1, 1], [], []>} : vector<2x32xf32>, vector<32x128xf32>, vector<2x128xf32> -> vector<2x128xf32>
      %122 = arith.index_cast %c2_i32 : i32 to index
      %c0_39 = arith.constant 0 : index
      %c0_40 = arith.constant 0 : index
      %123 = vector.load %arg11[%122, %c0_39, %c0_40] : memref<8x2x128xf32, #tpu.memory_space<vmem>>, vector<1x2x128xf32>
      %124 = vector.shape_cast %123 : vector<1x2x128xf32> to vector<2x128xf32>
      %125 = arith.addf %121, %124 : vector<2x128xf32>
      %126 = vector.extract_strided_slice %125 {offsets = [0, 0], sizes = [2, 32], strides = [1, 1]} : vector<2x128xf32> to vector<2x32xf32>
      %127 = arith.negf %126 : vector<2x32xf32>
      %128 = math.exp %127 : vector<2x32xf32>
      %cst_41 = arith.constant 1.000000e+00 : f32
      %129 = vector.broadcast %cst_41 : f32 to vector<2x32xf32>
      %130 = arith.addf %129, %128 : vector<2x32xf32>
      %131 = arith.divf %129, %130 : vector<2x32xf32>
      %132 = vector.extract_strided_slice %125 {offsets = [0, 32], sizes = [2, 32], strides = [1, 1]} : vector<2x128xf32> to vector<2x32xf32>
      %133 = arith.negf %132 : vector<2x32xf32>
      %134 = math.exp %133 : vector<2x32xf32>
      %cst_42 = arith.constant 1.000000e+00 : f32
      %135 = vector.broadcast %cst_42 : f32 to vector<2x32xf32>
      %136 = arith.addf %135, %134 : vector<2x32xf32>
      %137 = arith.divf %135, %136 : vector<2x32xf32>
      %138 = vector.extract_strided_slice %125 {offsets = [0, 64], sizes = [2, 32], strides = [1, 1]} : vector<2x128xf32> to vector<2x32xf32>
      %139 = math.tanh %138 : vector<2x32xf32>
      %140 = vector.extract_strided_slice %125 {offsets = [0, 96], sizes = [2, 32], strides = [1, 1]} : vector<2x128xf32> to vector<2x32xf32>
      %141 = arith.negf %140 : vector<2x32xf32>
      %142 = math.exp %141 : vector<2x32xf32>
      %cst_43 = arith.constant 1.000000e+00 : f32
      %143 = vector.broadcast %cst_43 : f32 to vector<2x32xf32>
      %144 = arith.addf %143, %142 : vector<2x32xf32>
      %145 = arith.divf %143, %144 : vector<2x32xf32>
      %146 = arith.mulf %137, %112 : vector<2x32xf32>
      %147 = arith.mulf %131, %139 : vector<2x32xf32>
      %148 = arith.addf %146, %147 : vector<2x32xf32>
      %149 = math.tanh %148 : vector<2x32xf32>
      %150 = arith.mulf %145, %149 : vector<2x32xf32>
      %151 = arith.addi %0, %c2_i32 : i32
      %152 = vector.broadcast %151 : i32 to vector<2x1xi32>
      %153 = arith.cmpi slt, %152, %24 : vector<2x1xi32>
      %154 = vector.shape_cast %153 : vector<2x1xi1> to vector<2x1xi1>
      %155 = vector.broadcast %154 : vector<2x1xi1> to vector<2x32xi1>
      %156 = arith.select %155, %150, %109 : vector<2x32xi1>, vector<2x32xf32>
      %157 = vector.shape_cast %153 : vector<2x1xi1> to vector<2x1xi1>
      %158 = vector.broadcast %157 : vector<2x1xi1> to vector<2x32xi1>
      %159 = arith.select %158, %148, %112 : vector<2x32xi1>, vector<2x32xf32>
      %cst_44 = arith.constant 0.000000e+00 : f32
      %160 = vector.shape_cast %153 : vector<2x1xi1> to vector<2x1xi1>
      %161 = vector.broadcast %160 : vector<2x1xi1> to vector<2x32xi1>
      %162 = vector.broadcast %cst_44 : f32 to vector<2x32xf32>
      %163 = arith.select %161, %150, %162 : vector<2x32xi1>, vector<2x32xf32>
      %164 = arith.index_cast %c2_i32 : i32 to index
      %c0_45 = arith.constant 0 : index
      %c0_46 = arith.constant 0 : index
      %165 = vector.load %arg8[%164, %c0_45, %c0_46] : memref<8x2x32xf32, #tpu.memory_space<vmem>>, vector<1x2x32xf32>
      %166 = vector.shape_cast %165 : vector<1x2x32xf32> to vector<2x32xf32>
      %167 = vector.shape_cast %163 : vector<2x32xf32> to vector<1x2x32xf32>
      tpu.vector_store %arg8[%164, %c0_45, %c0_46], %167 {strides = array<i32>} : memref<8x2x32xf32, #tpu.memory_space<vmem>>, vector<1x2x32xf32>,
      %c3_i32 = arith.constant 3 : i32
      %cst_47 = arith.constant dense<0.000000e+00> : vector<2x128xf32>
      %168 = tpu.matmul %156, %23, %cst_47 {dimension_numbers = #tpu.dot_dimension_numbers<[1], [0], [0], [1], [0, 0, 1, 1], [], []>} : vector<2x32xf32>, vector<32x128xf32>, vector<2x128xf32> -> vector<2x128xf32>
      %169 = arith.index_cast %c3_i32 : i32 to index
      %c0_48 = arith.constant 0 : index
      %c0_49 = arith.constant 0 : index
      %170 = vector.load %arg11[%169, %c0_48, %c0_49] : memref<8x2x128xf32, #tpu.memory_space<vmem>>, vector<1x2x128xf32>
      %171 = vector.shape_cast %170 : vector<1x2x128xf32> to vector<2x128xf32>
      %172 = arith.addf %168, %171 : vector<2x128xf32>
      %173 = vector.extract_strided_slice %172 {offsets = [0, 0], sizes = [2, 32], strides = [1, 1]} : vector<2x128xf32> to vector<2x32xf32>
      %174 = arith.negf %173 : vector<2x32xf32>
      %175 = math.exp %174 : vector<2x32xf32>
      %cst_50 = arith.constant 1.000000e+00 : f32
      %176 = vector.broadcast %cst_50 : f32 to vector<2x32xf32>
      %177 = arith.addf %176, %175 : vector<2x32xf32>
      %178 = arith.divf %176, %177 : vector<2x32xf32>
      %179 = vector.extract_strided_slice %172 {offsets = [0, 32], sizes = [2, 32], strides = [1, 1]} : vector<2x128xf32> to vector<2x32xf32>
      %180 = arith.negf %179 : vector<2x32xf32>
      %181 = math.exp %180 : vector<2x32xf32>
      %cst_51 = arith.constant 1.000000e+00 : f32
      %182 = vector.broadcast %cst_51 : f32 to vector<2x32xf32>
      %183 = arith.addf %182, %181 : vector<2x32xf32>
      %184 = arith.divf %182, %183 : vector<2x32xf32>
      %185 = vector.extract_strided_slice %172 {offsets = [0, 64], sizes = [2, 32], strides = [1, 1]} : vector<2x128xf32> to vector<2x32xf32>
      %186 = math.tanh %185 : vector<2x32xf32>
      %187 = vector.extract_strided_slice %172 {offsets = [0, 96], sizes = [2, 32], strides = [1, 1]} : vector<2x128xf32> to vector<2x32xf32>
      %188 = arith.negf %187 : vector<2x32xf32>
      %189 = math.exp %188 : vector<2x32xf32>
      %cst_52 = arith.constant 1.000000e+00 : f32
      %190 = vector.broadcast %cst_52 : f32 to vector<2x32xf32>
      %191 = arith.addf %190, %189 : vector<2x32xf32>
      %192 = arith.divf %190, %191 : vector<2x32xf32>
      %193 = arith.mulf %184, %159 : vector<2x32xf32>
      %194 = arith.mulf %178, %186 : vector<2x32xf32>
      %195 = arith.addf %193, %194 : vector<2x32xf32>
      %196 = math.tanh %195 : vector<2x32xf32>
      %197 = arith.mulf %192, %196 : vector<2x32xf32>
      %198 = arith.addi %0, %c3_i32 : i32
      %199 = vector.broadcast %198 : i32 to vector<2x1xi32>
      %200 = arith.cmpi slt, %199, %24 : vector<2x1xi32>
      %201 = vector.shape_cast %200 : vector<2x1xi1> to vector<2x1xi1>
      %202 = vector.broadcast %201 : vector<2x1xi1> to vector<2x32xi1>
      %203 = arith.select %202, %197, %156 : vector<2x32xi1>, vector<2x32xf32>
      %204 = vector.shape_cast %200 : vector<2x1xi1> to vector<2x1xi1>
      %205 = vector.broadcast %204 : vector<2x1xi1> to vector<2x32xi1>
      %206 = arith.select %205, %195, %159 : vector<2x32xi1>, vector<2x32xf32>
      %cst_53 = arith.constant 0.000000e+00 : f32
      %207 = vector.shape_cast %200 : vector<2x1xi1> to vector<2x1xi1>
      %208 = vector.broadcast %207 : vector<2x1xi1> to vector<2x32xi1>
      %209 = vector.broadcast %cst_53 : f32 to vector<2x32xf32>
      %210 = arith.select %208, %197, %209 : vector<2x32xi1>, vector<2x32xf32>
      %211 = arith.index_cast %c3_i32 : i32 to index
      %c0_54 = arith.constant 0 : index
      %c0_55 = arith.constant 0 : index
      %212 = vector.load %arg8[%211, %c0_54, %c0_55] : memref<8x2x32xf32, #tpu.memory_space<vmem>>, vector<1x2x32xf32>
      %213 = vector.shape_cast %212 : vector<1x2x32xf32> to vector<2x32xf32>
      %214 = vector.shape_cast %210 : vector<2x32xf32> to vector<1x2x32xf32>
      tpu.vector_store %arg8[%211, %c0_54, %c0_55], %214 {strides = array<i32>} : memref<8x2x32xf32, #tpu.memory_space<vmem>>, vector<1x2x32xf32>,
      %c4_i32 = arith.constant 4 : i32
      %cst_56 = arith.constant dense<0.000000e+00> : vector<2x128xf32>
      %215 = tpu.matmul %203, %23, %cst_56 {dimension_numbers = #tpu.dot_dimension_numbers<[1], [0], [0], [1], [0, 0, 1, 1], [], []>} : vector<2x32xf32>, vector<32x128xf32>, vector<2x128xf32> -> vector<2x128xf32>
      %216 = arith.index_cast %c4_i32 : i32 to index
      %c0_57 = arith.constant 0 : index
      %c0_58 = arith.constant 0 : index
      %217 = vector.load %arg11[%216, %c0_57, %c0_58] : memref<8x2x128xf32, #tpu.memory_space<vmem>>, vector<1x2x128xf32>
      %218 = vector.shape_cast %217 : vector<1x2x128xf32> to vector<2x128xf32>
      %219 = arith.addf %215, %218 : vector<2x128xf32>
      %220 = vector.extract_strided_slice %219 {offsets = [0, 0], sizes = [2, 32], strides = [1, 1]} : vector<2x128xf32> to vector<2x32xf32>
      %221 = arith.negf %220 : vector<2x32xf32>
      %222 = math.exp %221 : vector<2x32xf32>
      %cst_59 = arith.constant 1.000000e+00 : f32
      %223 = vector.broadcast %cst_59 : f32 to vector<2x32xf32>
      %224 = arith.addf %223, %222 : vector<2x32xf32>
      %225 = arith.divf %223, %224 : vector<2x32xf32>
      %226 = vector.extract_strided_slice %219 {offsets = [0, 32], sizes = [2, 32], strides = [1, 1]} : vector<2x128xf32> to vector<2x32xf32>
      %227 = arith.negf %226 : vector<2x32xf32>
      %228 = math.exp %227 : vector<2x32xf32>
      %cst_60 = arith.constant 1.000000e+00 : f32
      %229 = vector.broadcast %cst_60 : f32 to vector<2x32xf32>
      %230 = arith.addf %229, %228 : vector<2x32xf32>
      %231 = arith.divf %229, %230 : vector<2x32xf32>
      %232 = vector.extract_strided_slice %219 {offsets = [0, 64], sizes = [2, 32], strides = [1, 1]} : vector<2x128xf32> to vector<2x32xf32>
      %233 = math.tanh %232 : vector<2x32xf32>
      %234 = vector.extract_strided_slice %219 {offsets = [0, 96], sizes = [2, 32], strides = [1, 1]} : vector<2x128xf32> to vector<2x32xf32>
      %235 = arith.negf %234 : vector<2x32xf32>
      %236 = math.exp %235 : vector<2x32xf32>
      %cst_61 = arith.constant 1.000000e+00 : f32
      %237 = vector.broadcast %cst_61 : f32 to vector<2x32xf32>
      %238 = arith.addf %237, %236 : vector<2x32xf32>
      %239 = arith.divf %237, %238 : vector<2x32xf32>
      %240 = arith.mulf %231, %206 : vector<2x32xf32>
      %241 = arith.mulf %225, %233 : vector<2x32xf32>
      %242 = arith.addf %240, %241 : vector<2x32xf32>
      %243 = math.tanh %242 : vector<2x32xf32>
      %244 = arith.mulf %239, %243 : vector<2x32xf32>
      %245 = arith.addi %0, %c4_i32 : i32
      %246 = vector.broadcast %245 : i32 to vector<2x1xi32>
      %247 = arith.cmpi slt, %246, %24 : vector<2x1xi32>
      %248 = vector.shape_cast %247 : vector<2x1xi1> to vector<2x1xi1>
      %249 = vector.broadcast %248 : vector<2x1xi1> to vector<2x32xi1>
      %250 = arith.select %249, %244, %203 : vector<2x32xi1>, vector<2x32xf32>
      %251 = vector.shape_cast %247 : vector<2x1xi1> to vector<2x1xi1>
      %252 = vector.broadcast %251 : vector<2x1xi1> to vector<2x32xi1>
      %253 = arith.select %252, %242, %206 : vector<2x32xi1>, vector<2x32xf32>
      %cst_62 = arith.constant 0.000000e+00 : f32
      %254 = vector.shape_cast %247 : vector<2x1xi1> to vector<2x1xi1>
      %255 = vector.broadcast %254 : vector<2x1xi1> to vector<2x32xi1>
      %256 = vector.broadcast %cst_62 : f32 to vector<2x32xf32>
      %257 = arith.select %255, %244, %256 : vector<2x32xi1>, vector<2x32xf32>
      %258 = arith.index_cast %c4_i32 : i32 to index
      %c0_63 = arith.constant 0 : index
      %c0_64 = arith.constant 0 : index
      %259 = vector.load %arg8[%258, %c0_63, %c0_64] : memref<8x2x32xf32, #tpu.memory_space<vmem>>, vector<1x2x32xf32>
      %260 = vector.shape_cast %259 : vector<1x2x32xf32> to vector<2x32xf32>
      %261 = vector.shape_cast %257 : vector<2x32xf32> to vector<1x2x32xf32>
      tpu.vector_store %arg8[%258, %c0_63, %c0_64], %261 {strides = array<i32>} : memref<8x2x32xf32, #tpu.memory_space<vmem>>, vector<1x2x32xf32>,
      %c5_i32 = arith.constant 5 : i32
      %cst_65 = arith.constant dense<0.000000e+00> : vector<2x128xf32>
      %262 = tpu.matmul %250, %23, %cst_65 {dimension_numbers = #tpu.dot_dimension_numbers<[1], [0], [0], [1], [0, 0, 1, 1], [], []>} : vector<2x32xf32>, vector<32x128xf32>, vector<2x128xf32> -> vector<2x128xf32>
      %263 = arith.index_cast %c5_i32 : i32 to index
      %c0_66 = arith.constant 0 : index
      %c0_67 = arith.constant 0 : index
      %264 = vector.load %arg11[%263, %c0_66, %c0_67] : memref<8x2x128xf32, #tpu.memory_space<vmem>>, vector<1x2x128xf32>
      %265 = vector.shape_cast %264 : vector<1x2x128xf32> to vector<2x128xf32>
      %266 = arith.addf %262, %265 : vector<2x128xf32>
      %267 = vector.extract_strided_slice %266 {offsets = [0, 0], sizes = [2, 32], strides = [1, 1]} : vector<2x128xf32> to vector<2x32xf32>
      %268 = arith.negf %267 : vector<2x32xf32>
      %269 = math.exp %268 : vector<2x32xf32>
      %cst_68 = arith.constant 1.000000e+00 : f32
      %270 = vector.broadcast %cst_68 : f32 to vector<2x32xf32>
      %271 = arith.addf %270, %269 : vector<2x32xf32>
      %272 = arith.divf %270, %271 : vector<2x32xf32>
      %273 = vector.extract_strided_slice %266 {offsets = [0, 32], sizes = [2, 32], strides = [1, 1]} : vector<2x128xf32> to vector<2x32xf32>
      %274 = arith.negf %273 : vector<2x32xf32>
      %275 = math.exp %274 : vector<2x32xf32>
      %cst_69 = arith.constant 1.000000e+00 : f32
      %276 = vector.broadcast %cst_69 : f32 to vector<2x32xf32>
      %277 = arith.addf %276, %275 : vector<2x32xf32>
      %278 = arith.divf %276, %277 : vector<2x32xf32>
      %279 = vector.extract_strided_slice %266 {offsets = [0, 64], sizes = [2, 32], strides = [1, 1]} : vector<2x128xf32> to vector<2x32xf32>
      %280 = math.tanh %279 : vector<2x32xf32>
      %281 = vector.extract_strided_slice %266 {offsets = [0, 96], sizes = [2, 32], strides = [1, 1]} : vector<2x128xf32> to vector<2x32xf32>
      %282 = arith.negf %281 : vector<2x32xf32>
      %283 = math.exp %282 : vector<2x32xf32>
      %cst_70 = arith.constant 1.000000e+00 : f32
      %284 = vector.broadcast %cst_70 : f32 to vector<2x32xf32>
      %285 = arith.addf %284, %283 : vector<2x32xf32>
      %286 = arith.divf %284, %285 : vector<2x32xf32>
      %287 = arith.mulf %278, %253 : vector<2x32xf32>
      %288 = arith.mulf %272, %280 : vector<2x32xf32>
      %289 = arith.addf %287, %288 : vector<2x32xf32>
      %290 = math.tanh %289 : vector<2x32xf32>
      %291 = arith.mulf %286, %290 : vector<2x32xf32>
      %292 = arith.addi %0, %c5_i32 : i32
      %293 = vector.broadcast %292 : i32 to vector<2x1xi32>
      %294 = arith.cmpi slt, %293, %24 : vector<2x1xi32>
      %295 = vector.shape_cast %294 : vector<2x1xi1> to vector<2x1xi1>
      %296 = vector.broadcast %295 : vector<2x1xi1> to vector<2x32xi1>
      %297 = arith.select %296, %291, %250 : vector<2x32xi1>, vector<2x32xf32>
      %298 = vector.shape_cast %294 : vector<2x1xi1> to vector<2x1xi1>
      %299 = vector.broadcast %298 : vector<2x1xi1> to vector<2x32xi1>
      %300 = arith.select %299, %289, %253 : vector<2x32xi1>, vector<2x32xf32>
      %cst_71 = arith.constant 0.000000e+00 : f32
      %301 = vector.shape_cast %294 : vector<2x1xi1> to vector<2x1xi1>
      %302 = vector.broadcast %301 : vector<2x1xi1> to vector<2x32xi1>
      %303 = vector.broadcast %cst_71 : f32 to vector<2x32xf32>
      %304 = arith.select %302, %291, %303 : vector<2x32xi1>, vector<2x32xf32>
      %305 = arith.index_cast %c5_i32 : i32 to index
      %c0_72 = arith.constant 0 : index
      %c0_73 = arith.constant 0 : index
      %306 = vector.load %arg8[%305, %c0_72, %c0_73] : memref<8x2x32xf32, #tpu.memory_space<vmem>>, vector<1x2x32xf32>
      %307 = vector.shape_cast %306 : vector<1x2x32xf32> to vector<2x32xf32>
      %308 = vector.shape_cast %304 : vector<2x32xf32> to vector<1x2x32xf32>
      tpu.vector_store %arg8[%305, %c0_72, %c0_73], %308 {strides = array<i32>} : memref<8x2x32xf32, #tpu.memory_space<vmem>>, vector<1x2x32xf32>,
      %c6_i32 = arith.constant 6 : i32
      %cst_74 = arith.constant dense<0.000000e+00> : vector<2x128xf32>
      %309 = tpu.matmul %297, %23, %cst_74 {dimension_numbers = #tpu.dot_dimension_numbers<[1], [0], [0], [1], [0, 0, 1, 1], [], []>} : vector<2x32xf32>, vector<32x128xf32>, vector<2x128xf32> -> vector<2x128xf32>
      %310 = arith.index_cast %c6_i32 : i32 to index
      %c0_75 = arith.constant 0 : index
      %c0_76 = arith.constant 0 : index
      %311 = vector.load %arg11[%310, %c0_75, %c0_76] : memref<8x2x128xf32, #tpu.memory_space<vmem>>, vector<1x2x128xf32>
      %312 = vector.shape_cast %311 : vector<1x2x128xf32> to vector<2x128xf32>
      %313 = arith.addf %309, %312 : vector<2x128xf32>
      %314 = vector.extract_strided_slice %313 {offsets = [0, 0], sizes = [2, 32], strides = [1, 1]} : vector<2x128xf32> to vector<2x32xf32>
      %315 = arith.negf %314 : vector<2x32xf32>
      %316 = math.exp %315 : vector<2x32xf32>
      %cst_77 = arith.constant 1.000000e+00 : f32
      %317 = vector.broadcast %cst_77 : f32 to vector<2x32xf32>
      %318 = arith.addf %317, %316 : vector<2x32xf32>
      %319 = arith.divf %317, %318 : vector<2x32xf32>
      %320 = vector.extract_strided_slice %313 {offsets = [0, 32], sizes = [2, 32], strides = [1, 1]} : vector<2x128xf32> to vector<2x32xf32>
      %321 = arith.negf %320 : vector<2x32xf32>
      %322 = math.exp %321 : vector<2x32xf32>
      %cst_78 = arith.constant 1.000000e+00 : f32
      %323 = vector.broadcast %cst_78 : f32 to vector<2x32xf32>
      %324 = arith.addf %323, %322 : vector<2x32xf32>
      %325 = arith.divf %323, %324 : vector<2x32xf32>
      %326 = vector.extract_strided_slice %313 {offsets = [0, 64], sizes = [2, 32], strides = [1, 1]} : vector<2x128xf32> to vector<2x32xf32>
      %327 = math.tanh %326 : vector<2x32xf32>
      %328 = vector.extract_strided_slice %313 {offsets = [0, 96], sizes = [2, 32], strides = [1, 1]} : vector<2x128xf32> to vector<2x32xf32>
      %329 = arith.negf %328 : vector<2x32xf32>
      %330 = math.exp %329 : vector<2x32xf32>
      %cst_79 = arith.constant 1.000000e+00 : f32
      %331 = vector.broadcast %cst_79 : f32 to vector<2x32xf32>
      %332 = arith.addf %331, %330 : vector<2x32xf32>
      %333 = arith.divf %331, %332 : vector<2x32xf32>
      %334 = arith.mulf %325, %300 : vector<2x32xf32>
      %335 = arith.mulf %319, %327 : vector<2x32xf32>
      %336 = arith.addf %334, %335 : vector<2x32xf32>
      %337 = math.tanh %336 : vector<2x32xf32>
      %338 = arith.mulf %333, %337 : vector<2x32xf32>
      %339 = arith.addi %0, %c6_i32 : i32
      %340 = vector.broadcast %339 : i32 to vector<2x1xi32>
      %341 = arith.cmpi slt, %340, %24 : vector<2x1xi32>
      %342 = vector.shape_cast %341 : vector<2x1xi1> to vector<2x1xi1>
      %343 = vector.broadcast %342 : vector<2x1xi1> to vector<2x32xi1>
      %344 = arith.select %343, %338, %297 : vector<2x32xi1>, vector<2x32xf32>
      %345 = vector.shape_cast %341 : vector<2x1xi1> to vector<2x1xi1>
      %346 = vector.broadcast %345 : vector<2x1xi1> to vector<2x32xi1>
      %347 = arith.select %346, %336, %300 : vector<2x32xi1>, vector<2x32xf32>
      %cst_80 = arith.constant 0.000000e+00 : f32
      %348 = vector.shape_cast %341 : vector<2x1xi1> to vector<2x1xi1>
      %349 = vector.broadcast %348 : vector<2x1xi1> to vector<2x32xi1>
      %350 = vector.broadcast %cst_80 : f32 to vector<2x32xf32>
      %351 = arith.select %349, %338, %350 : vector<2x32xi1>, vector<2x32xf32>
      %352 = arith.index_cast %c6_i32 : i32 to index
      %c0_81 = arith.constant 0 : index
      %c0_82 = arith.constant 0 : index
      %353 = vector.load %arg8[%352, %c0_81, %c0_82] : memref<8x2x32xf32, #tpu.memory_space<vmem>>, vector<1x2x32xf32>
      %354 = vector.shape_cast %353 : vector<1x2x32xf32> to vector<2x32xf32>
      %355 = vector.shape_cast %351 : vector<2x32xf32> to vector<1x2x32xf32>
      tpu.vector_store %arg8[%352, %c0_81, %c0_82], %355 {strides = array<i32>} : memref<8x2x32xf32, #tpu.memory_space<vmem>>, vector<1x2x32xf32>,
      %c7_i32 = arith.constant 7 : i32
      %cst_83 = arith.constant dense<0.000000e+00> : vector<2x128xf32>
      %356 = tpu.matmul %344, %23, %cst_83 {dimension_numbers = #tpu.dot_dimension_numbers<[1], [0], [0], [1], [0, 0, 1, 1], [], []>} : vector<2x32xf32>, vector<32x128xf32>, vector<2x128xf32> -> vector<2x128xf32>
      %357 = arith.index_cast %c7_i32 : i32 to index
      %c0_84 = arith.constant 0 : index
      %c0_85 = arith.constant 0 : index
      %358 = vector.load %arg11[%357, %c0_84, %c0_85] : memref<8x2x128xf32, #tpu.memory_space<vmem>>, vector<1x2x128xf32>
      %359 = vector.shape_cast %358 : vector<1x2x128xf32> to vector<2x128xf32>
      %360 = arith.addf %356, %359 : vector<2x128xf32>
      %361 = vector.extract_strided_slice %360 {offsets = [0, 0], sizes = [2, 32], strides = [1, 1]} : vector<2x128xf32> to vector<2x32xf32>
      %362 = arith.negf %361 : vector<2x32xf32>
      %363 = math.exp %362 : vector<2x32xf32>
      %cst_86 = arith.constant 1.000000e+00 : f32
      %364 = vector.broadcast %cst_86 : f32 to vector<2x32xf32>
      %365 = arith.addf %364, %363 : vector<2x32xf32>
      %366 = arith.divf %364, %365 : vector<2x32xf32>
      %367 = vector.extract_strided_slice %360 {offsets = [0, 32], sizes = [2, 32], strides = [1, 1]} : vector<2x128xf32> to vector<2x32xf32>
      %368 = arith.negf %367 : vector<2x32xf32>
      %369 = math.exp %368 : vector<2x32xf32>
      %cst_87 = arith.constant 1.000000e+00 : f32
      %370 = vector.broadcast %cst_87 : f32 to vector<2x32xf32>
      %371 = arith.addf %370, %369 : vector<2x32xf32>
      %372 = arith.divf %370, %371 : vector<2x32xf32>
      %373 = vector.extract_strided_slice %360 {offsets = [0, 64], sizes = [2, 32], strides = [1, 1]} : vector<2x128xf32> to vector<2x32xf32>
      %374 = math.tanh %373 : vector<2x32xf32>
      %375 = vector.extract_strided_slice %360 {offsets = [0, 96], sizes = [2, 32], strides = [1, 1]} : vector<2x128xf32> to vector<2x32xf32>
      %376 = arith.negf %375 : vector<2x32xf32>
      %377 = math.exp %376 : vector<2x32xf32>
      %cst_88 = arith.constant 1.000000e+00 : f32
      %378 = vector.broadcast %cst_88 : f32 to vector<2x32xf32>
      %379 = arith.addf %378, %377 : vector<2x32xf32>
      %380 = arith.divf %378, %379 : vector<2x32xf32>
      %381 = arith.mulf %372, %347 : vector<2x32xf32>
      %382 = arith.mulf %366, %374 : vector<2x32xf32>
      %383 = arith.addf %381, %382 : vector<2x32xf32>
      %384 = math.tanh %383 : vector<2x32xf32>
      %385 = arith.mulf %380, %384 : vector<2x32xf32>
      %386 = arith.addi %0, %c7_i32 : i32
      %387 = vector.broadcast %386 : i32 to vector<2x1xi32>
      %388 = arith.cmpi slt, %387, %24 : vector<2x1xi32>
      %389 = vector.shape_cast %388 : vector<2x1xi1> to vector<2x1xi1>
      %390 = vector.broadcast %389 : vector<2x1xi1> to vector<2x32xi1>
      %391 = arith.select %390, %385, %344 : vector<2x32xi1>, vector<2x32xf32>
      %392 = vector.shape_cast %388 : vector<2x1xi1> to vector<2x1xi1>
      %393 = vector.broadcast %392 : vector<2x1xi1> to vector<2x32xi1>
      %394 = arith.select %393, %383, %347 : vector<2x32xi1>, vector<2x32xf32>
      %cst_89 = arith.constant 0.000000e+00 : f32
      %395 = vector.shape_cast %388 : vector<2x1xi1> to vector<2x1xi1>
      %396 = vector.broadcast %395 : vector<2x1xi1> to vector<2x32xi1>
      %397 = vector.broadcast %cst_89 : f32 to vector<2x32xf32>
      %398 = arith.select %396, %385, %397 : vector<2x32xi1>, vector<2x32xf32>
      %399 = arith.index_cast %c7_i32 : i32 to index
      %c0_90 = arith.constant 0 : index
      %c0_91 = arith.constant 0 : index
      %400 = vector.load %arg8[%399, %c0_90, %c0_91] : memref<8x2x32xf32, #tpu.memory_space<vmem>>, vector<1x2x32xf32>
      %401 = vector.shape_cast %400 : vector<1x2x32xf32> to vector<2x32xf32>
      %402 = vector.shape_cast %398 : vector<2x32xf32> to vector<1x2x32xf32>
      tpu.vector_store %arg8[%399, %c0_90, %c0_91], %402 {strides = array<i32>} : memref<8x2x32xf32, #tpu.memory_space<vmem>>, vector<1x2x32xf32>,
      %c8_i32_92 = arith.constant 8 : i32
      %c0_93 = arith.constant 0 : index
      %c0_94 = arith.constant 0 : index
      %403 = vector.load %arg9[%c0_93, %c0_94] : memref<2x32xf32, #tpu.memory_space<vmem>>, vector<2x32xf32>
      tpu.vector_store %arg9[%c0_93, %c0_94], %391 {strides = array<i32>} : memref<2x32xf32, #tpu.memory_space<vmem>>, vector<2x32xf32>,
      %c0_95 = arith.constant 0 : index
      %c0_96 = arith.constant 0 : index
      %404 = vector.load %arg10[%c0_95, %c0_96] : memref<2x32xf32, #tpu.memory_space<vmem>>, vector<2x32xf32>
      tpu.vector_store %arg10[%c0_95, %c0_96], %394 {strides = array<i32>} : memref<2x32xf32, #tpu.memory_space<vmem>>, vector<2x32xf32>,
    } else {
    }
    return
  }
  func.func @transform_0(%arg0: i32, %arg1: i32, %arg2: memref<1xi32, #tpu.memory_space<smem>>) -> (i32, i32) {
    %c0_i32 = arith.constant 0 : i32
    return %arg1, %arg0 : i32, i32
  }
  func.func @transform_1(%arg0: i32, %arg1: i32, %arg2: memref<1xi32, #tpu.memory_space<smem>>) -> (i32, i32) {
    %c0_i32 = arith.constant 0 : i32
    %c0_i32_0 = arith.constant 0 : i32
    return %arg0, %c0_i32 : i32, i32
  }
  func.func @transform_2(%arg0: i32, %arg1: i32, %arg2: memref<1xi32, #tpu.memory_space<smem>>) -> (i32, i32) {
    %c0_i32 = arith.constant 0 : i32
    %c0_i32_0 = arith.constant 0 : i32
    %c0_i32_1 = arith.constant 0 : i32
    return %c0_i32, %c0_i32_0 : i32, i32
  }
  func.func @transform_3(%arg0: i32, %arg1: i32, %arg2: memref<1xi32, #tpu.memory_space<smem>>) -> (i32, i32) {
    %c0_i32 = arith.constant 0 : i32
    %c0_i32_0 = arith.constant 0 : i32
    %c0_i32_1 = arith.constant 0 : i32
    return %c0_i32, %c0_i32_0 : i32, i32
  }
  func.func @transform_4(%arg0: i32, %arg1: i32, %arg2: memref<1xi32, #tpu.memory_space<smem>>) -> (i32, i32) {
    %c0_i32 = arith.constant 0 : i32
    %c0_i32_0 = arith.constant 0 : i32
    %c0_i32_1 = arith.constant 0 : i32
    return %c0_i32, %c0_i32_0 : i32, i32
  }
  func.func @transform_5(%arg0: i32, %arg1: i32, %arg2: memref<1xi32, #tpu.memory_space<smem>>) -> (i32, i32, i32) {
    %c0_i32 = arith.constant 0 : i32
    %c0_i32_0 = arith.constant 0 : i32
    return %arg1, %arg0, %c0_i32 : i32, i32, i32
  }
  func.func @transform_6(%arg0: i32, %arg1: i32, %arg2: memref<1xi32, #tpu.memory_space<smem>>) -> (i32, i32) {
    %c0_i32 = arith.constant 0 : i32
    %c0_i32_0 = arith.constant 0 : i32
    return %arg0, %c0_i32 : i32, i32
  }
  func.func @transform_7(%arg0: i32, %arg1: i32, %arg2: memref<1xi32, #tpu.memory_space<smem>>) -> (i32, i32) {
    %c0_i32 = arith.constant 0 : i32
    %c0_i32_0 = arith.constant 0 : i32
    return %arg0, %c0_i32 : i32, i32
  }
}

</mosaic_0001>

<bundles_post_ra>
// kernel: tpu_custom_call.1
= control target key start
LH: loop header
LB: loop body
LE: loop exit
PB: predicated region body
PF: predicated region fallthrough
CT: control target
= control target key end

     0   :  { %s2612_s0 = inlined_call_operand.<no memory space> [shape: s32[1], index: 0, kind: input, shape index: {}]   ;;  %s2613_s1 = inlined_call_operand.vmem [shape: f32[24,2], index: 1, kind: input, shape index: {}]   ;;  %s2614_s2 = inlined_call_operand.vmem [shape: s32[2,1], index: 2, kind: input, shape index: {}]   ;;  %s2615_s3 = inlined_call_operand.vmem [shape: f32[1,128], index: 3, kind: input, shape index: {}]   ;;  %s2616_s4 = inlined_call_operand.vmem [shape: f32[32,128], index: 4, kind: input, shape index: {}]   ;;  %s2617_s5 = inlined_call_operand.vmem [shape: f32[1,128], index: 5, kind: input, shape index: {}]   ;;  %s2618_s6 = inlined_call_operand.hbm [shape: f32[24,2,32], index: 6, kind: output, shape index: {0}]   ;;  %s2619_s7 = inlined_call_operand.hbm [shape: f32[2,32], index: 7, kind: output, shape index: {1}]   ;;  %s2620_s8 = inlined_call_operand.hbm [shape: f32[2,32], index: 8, kind: output, shape index: {2}]  }
   0x1   :  { %14 = sst [smem:[#allocation4]] %s2612_s0 }
   0x2   :  { %15 = vsyncpa [#allocation6], 0 }
   0x3   :  { %17 = vsyncpa [#allocation6 + $0x1], 0 }
   0x4   :  { %18 = vsyncpa [#allocation8], 0  ;;  %s2133_s29 = smov 0   ;;  %s2135_s30 = smov 0  }
   0x5   :  { %s2137_s9 = smov 0   ;;  %s2139_s10 = smov 0  }
   0x6   :  { %s2141_s11 = smov 0   ;;  %s2143_s12 = smov 0  }
   0x7 LB: > { %s1567_s0 = sadd.s32 4294967295, %s2069_s12   ;;  %s1568_s13 = sadd.s32 4294967294, %s2069_s12   ;;  %s2069_s12 = sphi %s2143_s12, %s24_s12   ;;  %s2065_s11 = sphi %s2141_s11, %s2628_s11   ;;  %s2061_s10 = sphi %s2139_s10, %s2627_s10   ;;  %s2057_s9 = sphi %s2137_s9, %s2626_s9   ;;  %s2053_s30 = sphi %s2135_s30, %s2625_s30   ;;  %s2049_s29 = sphi %s2133_s29, %s2624_s29  }
   0x8   : > { %s33_s14 = sadd.s32 1, %s2065_s11  ;;  %s162_s15 = sadd.s32 1, %s2057_s9 }
   0x9   : > { %p34_p0 = scmp.ge.s32.totalorder %s33_s14, 3  ;;  %p172_p1 = scmp.ne.s32.totalorder %s2057_s9, %s2053_s30 }
   0xa   : > { %p2169_p2 = scmp.eq.s32.totalorder %s1567_s0, 2  ;;  %p178_p3 = scmp.ne.s32.totalorder %s2053_s30, %s2049_s29 }
   0xb   : > { %s2630_s14 = smov (%p34_p0, %s33_s14), 0  ;;  %p179_p5 = scmp.eq.s32.totalorder %s1568_s13, 2 }
   0xc   : > { %p2179_p4 = por %p2169_p2, %p172_p1  ;;  %s157_s18 = ssub.s32 %s2065_s11, %s2630_s14 }
   0xd   : > { %p1572_p6 = scmp.ge.s32.totalorder %s2069_s12, 1  ;;  %p160_p7 = scmp.eq.s32.totalorder %s157_s18, 0 }
   0xe   : > { %p2186_p8 = por %p179_p5, %p178_p3  ;;  %p275_p9 = scmp.lt.s32.totalorder %s2069_s12, 4 }
   0xf   : > { %s2192_s20 = scalar_select %p160_p7, %s2057_s9, %s162_s15  }
  0x10   : > { %p276_p10 = pnand %p1572_p6, %p275_p9 }
  0x11   : > { %s306_s21 = sand.u32 (!%p276_p10), 1, %s2053_s30   ;;  %p313_p11 = scmp.lt.s32.totalorder (!%p276_p10), %s2061_s10, 2 }
  0x12   : > { %279 = sbr.rel (%p276_p10) target bundleno = 5757 (0x167d), region = 40  ;;  %s1573_s22 = sshll.u32 (!%p276_p10), %s306_s21, 4 }
  0x13   : > { %s2199_s23 = sshll.u32 (!%p276_p10), %s2061_s10, 3  ;;  %s326_s24 = sld [smem:[#allocation4]] (!%p276_p10) }
  0x14   : > { %s2207_s13 = scalar_lea.vmem (!%p276_p10), [#allocation5], %s1573_s22  ;;  %p1576_p12 = scmp.ne.s32.totalorder (!%p276_p10), %s2061_s10, 0 }
  0x19   : > { %s314_s25 = scalar_select %p313_p11, %s2061_s10, 2 }
  0x1a   : > { %330 = sbr.rel (%p1576_p12) target bundleno = 33 (0x21), region = 44  ;;  %vm331_vm0 = vcmask (!%p1576_p12), 254976   ;;  %v2071_v0 = vmov (!%p1576_p12), 0.0  }
  0x1b   : > { %s1574_s26 = sshll.u32 %s314_s25, 3  ;;  %332 = vst.msk [vmem:[#allocation7] sm:$0x3] (!%p1576_p12), %vm331_vm0, %v2071_v0  ;;  %333 = vst.msk [vmem:[#allocation9] sm:$0x3] (!%p1576_p12), %vm331_vm0, %v2071_v0 }
  0x1c   : > { %s2205_s0 = scalar_lea.vmem %s2613_s1, %s1574_s26 }
  0x21 PF: > { %p1577_p13 = scmp.lt.s32.totalorder %s2199_s23, %s326_s24 }
  0x22   : > { %vm338_vm1 = vcmask (!%p1577_p13), 254976   ;;  %v2072_v1 = vmov (!%p1577_p13), 0.0  }
  0x23   : > { %337 = sbr.rel (%p1577_p13) target bundleno = 42 (0x2a), region = 48  ;;  %339 = vst.msk [vmem:[%s2207_s13] sm:$0x3] (!%p1577_p13), %vm338_vm1, %v2072_v1  ;;  %340 = vst.msk [vmem:[%s2207_s13 + $0x2] sm:$0x3] (!%p1577_p13), %vm338_vm1, %v2072_v1 }
  0x24   : > { %341 = vst.msk [vmem:[%s2207_s13 + $0x4] sm:$0x3] (!%p1577_p13), %vm338_vm1, %v2072_v1  ;;  %342 = vst.msk [vmem:[%s2207_s13 + $0x6] sm:$0x3] (!%p1577_p13), %vm338_vm1, %v2072_v1 }
  0x25   : > { %343 = vst.msk [vmem:[%s2207_s13 + $0x8] sm:$0x3] (!%p1577_p13), %vm338_vm1, %v2072_v1  ;;  %344 = vst.msk [vmem:[%s2207_s13 + $0xa] sm:$0x3] (!%p1577_p13), %vm338_vm1, %v2072_v1 }
  0x26   : > { %345 = vst.msk [vmem:[%s2207_s13 + $0xc] sm:$0x3] (!%p1577_p13), %vm338_vm1, %v2072_v1  ;;  %346 = vst.msk [vmem:[%s2207_s13 + $0xe] sm:$0x3] (!%p1577_p13), %vm338_vm1, %v2072_v1 }
  0x2a PF: > { %p1578_p0 = scmp.ge.s32.totalorder %s2199_s23, %s326_s24 }
  0x2b   : > { %v446_v2 = vld [vmem:[%s2616_s4] sm:$0xff] (!%p1578_p0)  ;;  %v447_v3 = vld [vmem:[%s2616_s4 + $0x8] sm:$0xff] (!%p1578_p0)  ;;  %v448_v4 = vld [vmem:[%s2616_s4 + $0x10] sm:$0xff] (!%p1578_p0)  ;;  %v352_v5 = vlaneseq (!%p1578_p0)  ;;  %v2073_v6 = vmov (!%p1578_p0), 0.0|0.0   ;;  %vm2074_vm2 = vmmov (!%p1578_p0), 0   ;;  %v2075_v9 = vmov (!%p1578_p0), 0.0  }
  0x2c   : > { %350 = sbr.rel (%p1578_p0) target bundleno = 5684 (0x1634), region = 52  ;;  %1742 = vmatprep.subr.bf16.mxu0 (!%p1578_p0), %v2073_v6  ;;  %v2230_v7 = vpack.c.bf16 (!%p1578_p0), %v447_v3, %v446_v2  ;;  %v449_v8 = vld [vmem:[%s2616_s4 + $0x18] sm:$0xff] (!%p1578_p0)  ;;  %1662 = vmatprep.mubr.msk.f32.mxu0 (!%p1578_p0), %vm2074_vm2, %v2075_v9  ;;  %v452_v11 = vld [vmem:[#allocation9] sm:$0x3] (!%p1578_p0)  ;;  %v2246_v13 = vld [vmem:[%s2205_s0] sm:$0xff] (!%p1578_p0)  ;;  %s2076_s15 = smov (!%p1578_p0), 32   ;;  %v556_v28 = vstv (!%p1578_p0), %s2199_s23 }
  0x2d   : > { %v2237_v10 = vshrl.u32 (!%p1578_p0), %v352_v5, 7  ;;  %1748 = vmatprep.subr.bf16.mxu1 (!%p1578_p0), %v2073_v6  ;;  %1673 = vmatprep.mubr.msk.f32.mxu1 (!%p1578_p0), %vm2074_vm2, %v2075_v9  ;;  %v2243_v12 = vpack.c.bf16 (!%p1578_p0), %v449_v8, %v448_v4  ;;  %v451_v16 = vld [vmem:[#allocation7] sm:$0x3] (!%p1578_p0)  ;;  %vm454_vm3 = vcmask (!%p1578_p0), 261120   ;;  %v2268_v17 = vld [vmem:[%s2615_s3] ss:$0 sm:$0xff] (!%p1578_p0) }
  0x2e   : > { %1744 = vmatpush3.bf16.msra.mxu0 (!%p1578_p0), %v2230_v7  ;;  %536 = vrot.lane.b32.xlu1 (!%p1578_p0), %v452_v11, %s2076_s15  ;;  %v2273_v18 = vld [vmem:[%s2617_s5] ss:$0 sm:$0xff] (!%p1578_p0)  ;;  %v2077_v21 = vmov (!%p1578_p0), 0   ;;  %s2078_s24 = smov (!%p1578_p0), 64   ;;  %s2079_s28 = smov (!%p1578_p0), 96  }
  0x2f   : > { %1745 = vmatprep.subr.bf16.mxu0 (!%p1578_p0), %v2073_v6  ;;  %v354_v14 = vsub.s32 (!%p1578_p0), 0, %v2237_v10  ;;  %1750 = vmatpush3.bf16.msra.mxu1 (!%p1578_p0), %v2230_v7  ;;  %v2281_v27 = vld [vmem:[%s2614_s2] sm:$0x3] (!%p1578_p0)  ;;  %v361_v42 = vsub.s32 (!%p1578_p0), 1, %v2237_v10  ;;  %s676_s0 = sadd.s32 (!%p1578_p0), 1, %s2199_s23  ;;  %v368_v11 = vsub.s32 (!%p1578_p0), 2, %v2237_v10 }
  0x30   : > { %1751 = vmatprep.subr.bf16.mxu1 (!%p1578_p0), %v2073_v6  ;;  %1870 = vset.pattern.permute.xlu0 (!%p1578_p0), %v2077_v21  ;;  %vm557_vm4 = vcmp.lt.s32.totalorder (!%p1578_p0), %v556_v28, %v2281_v27  ;;  %v677_v57 = vstv (!%p1578_p0), %s676_s0  ;;  %s794_s18 = sadd.s32 (!%p1578_p0), 2, %s2199_s23  ;;  %s912_s22 = sadd.s32 (!%p1578_p0), 3, %s2199_s23 }
  0x31   : > { %v355_v15 = vrot.slane (!%p1578_p0), %v2246_v13, %v354_v14  ;;  %v558_v30 = vsel (!%p1578_p0), %vm557_vm4, 1, %v2077_v21  ;;  %v362_v43 = vrot.slane (!%p1578_p0), %v2246_v13, %v361_v42  ;;  %vm678_vm6 = vcmp.lt.s32.totalorder (!%p1578_p0), %v677_v57, %v2281_v27  ;;  %s1030_s25 = sadd.s32 (!%p1578_p0), 4, %s2199_s23  ;;  %s1148_s26 = sadd.s32 (!%p1578_p0), 5, %s2199_s23 }
  0x32   : > { %1747 = vmatpush3.bf16.msra.mxu0 (!%p1578_p0), %v2243_v12  ;;  %v679_v59 = vsel (!%p1578_p0), %vm678_vm6, 1, %v2077_v21  ;;  %v369_v14 = vrot.slane (!%p1578_p0), %v2246_v13, %v368_v11  ;;  %s1266_s27 = sadd.s32 (!%p1578_p0), 6, %s2199_s23  ;;  %s1384_s0 = sadd.s32 (!%p1578_p0), 7, %s2199_s23 }
  0x33   : > { %357 = vbcast.lane.b32.xlu0 %v355_v15, 256  ;;  %1753 = vmatpush3.bf16.msra.mxu1 %v2243_v12 }
  0x34   : > { %1754 = vmatprep.subr.bf16.mxu0 %v2073_v6  ;;  %1760 = vmatprep.subr.bf16.mxu1 %v2073_v6 }
  0x35   : > { %1663 = vmatmul.mubr.msk.f32.vlgmr.msra.gmra.mrb[0].mxu0 %vm454_vm3, %v451_v16 }
  0x36   : > { %1756 = vmatpush3.bf16.msra.mxu0 %v2230_v7  ;;  %1684 = vmatprep.mubr.msk.f32.mxu0 %vm2074_vm2, %v2075_v9 }
  0x37   : > { %1757 = vmatprep.subr.bf16.mxu0 %v2073_v6 }
  0x3a   : > { %1759 = vmatpush3.bf16.msra.mxu0 %v2243_v12 }
  0x3b   : > { %1766 = vmatprep.subr.bf16.mxu0 %v2073_v6 }
  0xa0   : > { %v537_v37 = vpop.permute.xlu1 %536 }
  0xa5   : > { %v358_v19 = vpop.permute.xlu0 %357 }
  0xa6   : > { %v415_v20 = vmul.f32 %v2268_v17, %v358_v19 }
  0xa8   : > { %v430_v22 = vadd.f32 %v2273_v18, %v415_v20 }
  0xaa   : > { %438 = vst [vmem:[#allocation2] sm:$0x3] %v430_v22 }
  0xb1   : > { %v453_v23 = vld [vmem:[#allocation2] sm:$0x3] }
 0x108   : > { %v524_v24 = vpop.f32.mrb[0].mxu0 }
 0x109   : > { %v525_v25 = vadd.f32 %v524_v24, %v453_v23  ;;  %v1664_v26 = vpop.f32.mrb[1].mxu0 }
 0x10b   : > { %1871 = vtanh.f32 %v525_v25  ;;  %v1582_v31 = vmul.f32 -1.442695, %v525_v25 }
 0x10d   : > { %1873 = vpow2.f32 %v1582_v31  ;;  %v795_v31 = vstv %s794_s18 }
 0x10e   : > { %vm796_vm8 = vcmp.lt.s32.totalorder %v795_v31, %v2281_v27 }
 0x115   : > { %v1872_v29 = vpop.eup %1871 }
 0x116   : > { %541 = vrot.lane.b32.xlu0 %v1872_v29, %s2078_s24 }
 0x117   : > { %v1874_v32 = vpop.eup %1873 }
 0x118   : > { %v531_v33 = vadd.f32 1.0, %v1874_v32 }
 0x11a   : > { %560 = vperm.xlu0 %1870, %v558_v30   ;;  %1875 = vrcp.f32 %v531_v33  ;;  %v797_v33 = vsel %vm796_vm8, 1, %v2077_v21 }
 0x124   : > { %v1876_v34 = vpop.eup %1875 }
 0x125   : > { %v539_v38 = vmul.f32 %v1876_v34, %v537_v37 }
 0x188   : > { %v542_v35 = vpop.permute.xlu0 %541 }
 0x189   : > { %v544_v36 = vmul.f32 %v1876_v34, %v542_v35 }
 0x18b   : > { %546 = vrot.lane.b32.xlu1 %v544_v36, %s2076_s15 }
 0x199   : > { %v2292_v45 = vpop.permute.xlu0 %560 }
 0x19a   : > { %vm562_vm5 = vcmp.eq.s32.totalorder %v2292_v45, 1 }
 0x1fd   : > { %v547_v39 = vpop.permute.xlu1 %546 }
 0x1fe   : > { %v549_v40 = vadd.f32 %v547_v39, %v539_v38 }
 0x200   : > { %1877 = vtanh.f32 %v549_v40  ;;  %v567_v2 = vsel %vm562_vm5, %v549_v40, %v537_v37 }
 0x20a   : > { %v1878_v41 = vpop.eup %1877 }
 0x20b   : > { %552 = vrot.lane.b32.xlu1 %v1878_v41, %s2078_s24 }
 0x20f   : > { %563 = vrot.lane.b32.xlu1 %v451_v16, %s2079_s28 }
 0x213   : > { %364 = vbcast.lane.b32.xlu1 %v362_v43, 256 }
 0x27d   : > { %v553_v44 = vpop.permute.xlu1 %552 }
 0x27e   : > { %v2294_v46 = vmul.f32 %v1876_v34, %v553_v44 }
 0x281   : > { %v564_v47 = vpop.permute.xlu1 %563 }
 0x282   : > { %v566_v48 = vsel %vm562_vm5, %v2294_v46, %v564_v47  ;;  %v375_v47 = vsub.s32 3, %v2237_v10 }
 0x283   : > { %578 = vrot.lane.b32.xlu0 %v566_v48, %s2076_s15 }
 0x285   : > { %v365_v49 = vpop.permute.xlu1 %364 }
 0x286   : > { %v416_v50 = vmul.f32 %v2268_v17, %v365_v49 }
 0x288   : > { %v431_v51 = vadd.f32 %v2273_v18, %v416_v50 }
 0x28a   : > { %439 = vst [vmem:[#allocation2 + $0x2] sm:$0x3] %v431_v51 }
 0x291   : > { %v576_v53 = vld [vmem:[#allocation2 + $0x2] sm:$0x3] }
 0x2f5   : > { %v579_v52 = vpop.permute.xlu0 %578 }
 0x2f6   : > { %1674 = vmatmul.mubr.msk.f32.vlgmr.msra.gmra.mrb[0].mxu1 %vm454_vm3, %v579_v52 }
 0x2f7   : > { %1762 = vmatpush3.bf16.msra.mxu1 %v2230_v7  ;;  %1695 = vmatprep.mubr.msk.f32.mxu1 %vm2074_vm2, %v2075_v9 }
 0x2f8   : > { %1763 = vmatprep.subr.bf16.mxu1 %v2073_v6 }
 0x2fb   : > { %1765 = vmatpush3.bf16.msra.mxu1 %v2243_v12 }
 0x2fc   : > { %1772 = vmatprep.subr.bf16.mxu1 %v2073_v6 }
 0x3c9   : > { %v648_v54 = vpop.f32.mrb[0].mxu1 }
 0x3ca   : > { %v649_v55 = vadd.f32 %v648_v54, %v576_v53  ;;  %v1675_v56 = vpop.f32.mrb[1].mxu1 }
 0x3cc   : > { %1879 = vtanh.f32 %v649_v55  ;;  %v1584_v60 = vmul.f32 -1.442695, %v649_v55 }
 0x3ce   : > { %1881 = vpow2.f32 %v1584_v60 }
 0x3d6   : > { %v1880_v58 = vpop.eup %1879 }
 0x3d7   : > { %661 = vrot.lane.b32.xlu0 %v1880_v58, %s2078_s24 }
 0x3d8   : > { %v1882_v61 = vpop.eup %1881 }
 0x3d9   : > { %v655_v62 = vadd.f32 1.0, %v1882_v61  ;;  %v913_v61 = vstv %s912_s22 }
 0x3da   : > { %vm914_vm10 = vcmp.lt.s32.totalorder %v913_v61, %v2281_v27 }
 0x3db   : > { %681 = vperm.xlu0 %1870, %v679_v59   ;;  %1883 = vrcp.f32 %v655_v62 }
 0x3e5   : > { %v1884_v63 = vpop.eup %1883 }
 0x3e6   : > { %v659_v3 = vmul.f32 %v1884_v63, %v567_v2 }
 0x449   : > { %v662_v0 = vpop.permute.xlu0 %661 }
 0x44a   : > { %v664_v1 = vmul.f32 %v1884_v63, %v662_v0 }
 0x44c   : > { %666 = vrot.lane.b32.xlu1 %v664_v1, %s2076_s15 }
 0x45a   : > { %v2320_v15 = vpop.permute.xlu0 %681 }
 0x45b   : > { %vm683_vm7 = vcmp.eq.s32.totalorder %v2320_v15, 1 }
 0x4be   : > { %v667_v4 = vpop.permute.xlu1 %666 }
 0x4bf   : > { %v669_v5 = vadd.f32 %v667_v4, %v659_v3 }
 0x4c1   : > { %1885 = vtanh.f32 %v669_v5  ;;  %v685_v40 = vsel %vm683_vm7, %v669_v5, %v567_v2 }
 0x4cb   : > { %v1886_v8 = vpop.eup %1885 }
 0x4cc   : > { %672 = vrot.lane.b32.xlu1 %v1886_v8, %s2078_s24 }
 0x4d0   : > { %371 = vbcast.lane.b32.xlu1 %v369_v14, 256 }
 0x53e   : > { %v673_v16 = vpop.permute.xlu1 %672 }
 0x53f   : > { %v2322_v19 = vmul.f32 %v1884_v63, %v673_v16  ;;  %v915_v63 = vsel %vm914_vm10, 1, %v2077_v21 }
 0x541   : > { %v684_v20 = vsel %vm683_vm7, %v2322_v19, %v566_v48  ;;  %v376_v48 = vrot.slane %v2246_v13, %v375_v47 }
 0x542   : > { %696 = vrot.lane.b32.xlu0 %v684_v20, %s2076_s15  ;;  %v372_v22 = vpop.permute.xlu1 %371 }
 0x543   : > { %v417_v23 = vmul.f32 %v2268_v17, %v372_v22  ;;  %v382_v22 = vsub.s32 4, %v2237_v10 }
 0x545   : > { %v432_v24 = vadd.f32 %v2273_v18, %v417_v23  ;;  %v383_v23 = vrot.slane %v2246_v13, %v382_v22 }
 0x547   : > { %440 = vst [vmem:[#allocation2 + $0x4] sm:$0x3] %v432_v24 }
 0x54e   : > { %v694_v26 = vld [vmem:[#allocation2 + $0x4] sm:$0x3] }
 0x5b4   : > { %v697_v25 = vpop.permute.xlu0 %696 }
 0x5b5   : > { %1685 = vmatmul.mubr.msk.f32.vlgmr.msra.gmra.mrb[2].mxu0 %vm454_vm3, %v697_v25 }
 0x5b6   : > { %1768 = vmatpush3.bf16.msra.mxu0 %v2230_v7  ;;  %1706 = vmatprep.mubr.msk.f32.mxu0 %vm2074_vm2, %v2075_v9 }
 0x5b7   : > { %1769 = vmatprep.subr.bf16.mxu0 %v2073_v6 }
 0x5ba   : > { %1771 = vmatpush3.bf16.msra.mxu0 %v2243_v12 }
 0x5bb   : > { %1778 = vmatprep.subr.bf16.mxu0 %v2073_v6 }
 0x688   : > { %v766_v28 = vpop.f32.mrb[2].mxu0 }
 0x689   : > { %v767_v29 = vadd.f32 %v766_v28, %v694_v26  ;;  %v1686_v30 = vpop.f32.mrb[3].mxu0 }
 0x68b   : > { %1887 = vtanh.f32 %v767_v29  ;;  %v1587_v34 = vmul.f32 -1.442695, %v767_v29 }
 0x68d   : > { %1889 = vpow2.f32 %v1587_v34 }
 0x695   : > { %v1888_v32 = vpop.eup %1887 }
 0x696   : > { %779 = vrot.lane.b32.xlu0 %v1888_v32, %s2078_s24 }
 0x697   : > { %v1890_v35 = vpop.eup %1889 }
 0x698   : > { %v773_v36 = vadd.f32 1.0, %v1890_v35 }
 0x69a   : > { %799 = vperm.xlu0 %1870, %v797_v33   ;;  %1891 = vrcp.f32 %v773_v36 }
 0x6a4   : > { %v1892_v37 = vpop.eup %1891 }
 0x6a5   : > { %v777_v41 = vmul.f32 %v1892_v37, %v685_v40 }
 0x708   : > { %v780_v38 = vpop.permute.xlu0 %779 }
 0x709   : > { %v782_v39 = vmul.f32 %v1892_v37, %v780_v38 }
 0x70b   : > { %784 = vrot.lane.b32.xlu1 %v782_v39, %s2076_s15 }
 0x719   : > { %v2348_v49 = vpop.permute.xlu0 %799 }
 0x71a   : > { %vm801_vm9 = vcmp.eq.s32.totalorder %v2348_v49, 1 }
 0x77d   : > { %v785_v42 = vpop.permute.xlu1 %784 }
 0x77e   : > { %v787_v43 = vadd.f32 %v785_v42, %v777_v41 }
 0x780   : > { %1893 = vtanh.f32 %v787_v43  ;;  %v803_v8 = vsel %vm801_vm9, %v787_v43, %v685_v40 }
 0x78a   : > { %v1894_v44 = vpop.eup %1893 }
 0x78b   : > { %790 = vrot.lane.b32.xlu1 %v1894_v44, %s2078_s24 }
 0x78f   : > { %378 = vbcast.lane.b32.xlu1 %v376_v48, 256 }
 0x7fd   : > { %v791_v50 = vpop.permute.xlu1 %790 }
 0x7fe   : > { %v2350_v51 = vmul.f32 %v1892_v37, %v791_v50  ;;  %v1031_v37 = vstv %s1030_s25 }
 0x7ff   : > { %vm1032_vm12 = vcmp.lt.s32.totalorder %v1031_v37, %v2281_v27 }
 0x800   : > { %v802_v52 = vsel %vm801_vm9, %v2350_v51, %v684_v20  ;;  %v1033_v39 = vsel %vm1032_vm12, 1, %v2077_v21 }
 0x801   : > { %814 = vrot.lane.b32.xlu0 %v802_v52, %s2076_s15  ;;  %v379_v53 = vpop.permute.xlu1 %378 }
 0x802   : > { %v418_v54 = vmul.f32 %v2268_v17, %v379_v53 }
 0x804   : > { %v433_v55 = vadd.f32 %v2273_v18, %v418_v54 }
 0x806   : > { %441 = vst [vmem:[#allocation2 + $0x6] sm:$0x3] %v433_v55  ;;  %v389_v55 = vsub.s32 5, %v2237_v10 }
 0x80d   : > { %v812_v57 = vld [vmem:[#allocation2 + $0x6] sm:$0x3] }
 0x873   : > { %v815_v56 = vpop.permute.xlu0 %814 }
 0x874   : > { %1696 = vmatmul.mubr.msk.f32.vlgmr.msra.gmra.mrb[2].mxu1 %vm454_vm3, %v815_v56  ;;  %v390_v56 = vrot.slane %v2246_v13, %v389_v55 }
 0x875   : > { %1774 = vmatpush3.bf16.msra.mxu1 %v2230_v7  ;;  %1717 = vmatprep.mubr.msk.f32.mxu1 %vm2074_vm2, %v2075_v9 }
 0x876   : > { %1775 = vmatprep.subr.bf16.mxu1 %v2073_v6 }
 0x879   : > { %1777 = vmatpush3.bf16.msra.mxu1 %v2243_v12 }
 0x87a   : > { %1784 = vmatprep.subr.bf16.mxu1 %v2073_v6 }
 0x947   : > { %v884_v58 = vpop.f32.mrb[2].mxu1 }
 0x948   : > { %v885_v59 = vadd.f32 %v884_v58, %v812_v57  ;;  %v1697_v60 = vpop.f32.mrb[3].mxu1 }
 0x94a   : > { %1895 = vtanh.f32 %v885_v59  ;;  %v1590_v0 = vmul.f32 -1.442695, %v885_v59 }
 0x94c   : > { %1897 = vpow2.f32 %v1590_v0 }
 0x954   : > { %v1896_v62 = vpop.eup %1895 }
 0x955   : > { %897 = vrot.lane.b32.xlu0 %v1896_v62, %s2078_s24 }
 0x956   : > { %v1898_v1 = vpop.eup %1897 }
 0x957   : > { %v891_v2 = vadd.f32 1.0, %v1898_v1 }
 0x959   : > { %917 = vperm.xlu0 %1870, %v915_v63   ;;  %1899 = vrcp.f32 %v891_v2 }
 0x963   : > { %v1900_v3 = vpop.eup %1899 }
 0x964   : > { %v895_v11 = vmul.f32 %v1900_v3, %v803_v8 }
 0x9c7   : > { %v898_v4 = vpop.permute.xlu0 %897 }
 0x9c8   : > { %v900_v5 = vmul.f32 %v1900_v3, %v898_v4 }
 0x9ca   : > { %902 = vrot.lane.b32.xlu1 %v900_v5, %s2076_s15  ;;  %v1149_v5 = vstv %s1148_s26 }
 0x9cb   : > { %vm1150_vm14 = vcmp.lt.s32.totalorder %v1149_v5, %v2281_v27 }
 0x9d8   : > { %v2376_v24 = vpop.permute.xlu0 %917 }
 0x9d9   : > { %vm919_vm11 = vcmp.eq.s32.totalorder %v2376_v24, 1 }
 0xa3c   : > { %v903_v14 = vpop.permute.xlu1 %902 }
 0xa3d   : > { %v905_v16 = vadd.f32 %v903_v14, %v895_v11 }
 0xa3f   : > { %1901 = vtanh.f32 %v905_v16  ;;  %v921_v48 = vsel %vm919_vm11, %v905_v16, %v803_v8 }
 0xa49   : > { %v1902_v20 = vpop.eup %1901 }
 0xa4a   : > { %908 = vrot.lane.b32.xlu1 %v1902_v20, %s2078_s24 }
 0xa4e   : > { %385 = vbcast.lane.b32.xlu1 %v383_v23, 256 }
 0xabc   : > { %v909_v25 = vpop.permute.xlu1 %908 }
 0xabd   : > { %v2378_v26 = vmul.f32 %v1900_v3, %v909_v25 }
 0xabf   : > { %v920_v28 = vsel %vm919_vm11, %v2378_v26, %v802_v52 }
 0xac0   : > { %932 = vrot.lane.b32.xlu0 %v920_v28, %s2076_s15  ;;  %v386_v29 = vpop.permute.xlu1 %385 }
 0xac1   : > { %v419_v30 = vmul.f32 %v2268_v17, %v386_v29  ;;  %v396_v29 = vsub.s32 6, %v2237_v10 }
 0xac3   : > { %v434_v31 = vadd.f32 %v2273_v18, %v419_v30  ;;  %v397_v30 = vrot.slane %v2246_v13, %v396_v29 }
 0xac5   : > { %442 = vst [vmem:[#allocation2 + $0x8] sm:$0x3] %v434_v31 }
 0xacc   : > { %v930_v33 = vld [vmem:[#allocation2 + $0x8] sm:$0x3] }
 0xb32   : > { %v933_v32 = vpop.permute.xlu0 %932 }
 0xb33   : > { %1707 = vmatmul.mubr.msk.f32.vlgmr.msra.gmra.mrb[4].mxu0 %vm454_vm3, %v933_v32 }
 0xb34   : > { %1780 = vmatpush3.bf16.msra.mxu0 %v2230_v7  ;;  %1728 = vmatprep.mubr.msk.f32.mxu0 %vm2074_vm2, %v2075_v9 }
 0xb35   : > { %1781 = vmatprep.subr.bf16.mxu0 %v2073_v6 }
 0xb38   : > { %1783 = vmatpush3.bf16.msra.mxu0 %v2243_v12 }
 0xc06   : > { %v1002_v34 = vpop.f32.mrb[4].mxu0 }
 0xc07   : > { %v1003_v35 = vadd.f32 %v1002_v34, %v930_v33  ;;  %v1708_v36 = vpop.f32.mrb[5].mxu0 }
 0xc09   : > { %1903 = vtanh.f32 %v1003_v35  ;;  %v1593_v40 = vmul.f32 -1.442695, %v1003_v35 }
 0xc0b   : > { %1905 = vpow2.f32 %v1593_v40 }
 0xc13   : > { %v1904_v38 = vpop.eup %1903 }
 0xc14   : > { %1015 = vrot.lane.b32.xlu0 %v1904_v38, %s2078_s24 }
 0xc15   : > { %v1906_v41 = vpop.eup %1905 }
 0xc16   : > { %v1009_v42 = vadd.f32 1.0, %v1906_v41 }
 0xc18   : > { %1035 = vperm.xlu0 %1870, %v1033_v39   ;;  %1907 = vrcp.f32 %v1009_v42 }
 0xc22   : > { %v1908_v43 = vpop.eup %1907 }
 0xc23   : > { %v1013_v50 = vmul.f32 %v1908_v43, %v921_v48 }
 0xc86   : > { %v1016_v44 = vpop.permute.xlu0 %1015 }
 0xc87   : > { %v1018_v47 = vmul.f32 %v1908_v43, %v1016_v44 }
 0xc89   : > { %1020 = vrot.lane.b32.xlu1 %v1018_v47, %s2076_s15 }
 0xc97   : > { %v2403_v57 = vpop.permute.xlu0 %1035 }
 0xc98   : > { %vm1037_vm13 = vcmp.eq.s32.totalorder %v2403_v57, 1 }
 0xcfb   : > { %v1021_v52 = vpop.permute.xlu1 %1020 }
 0xcfc   : > { %v1023_v53 = vadd.f32 %v1021_v52, %v1013_v50 }
 0xcfe   : > { %1909 = vtanh.f32 %v1023_v53  ;;  %v1039_v20 = vsel %vm1037_vm13, %v1023_v53, %v921_v48 }
 0xd08   : > { %v1910_v54 = vpop.eup %1909 }
 0xd09   : > { %1026 = vrot.lane.b32.xlu1 %v1910_v54, %s2078_s24 }
 0xd0d   : > { %392 = vbcast.lane.b32.xlu1 %v390_v56, 256 }
 0xd7b   : > { %v1027_v58 = vpop.permute.xlu1 %1026 }
 0xd7c   : > { %v2405_v59 = vmul.f32 %v1908_v43, %v1027_v58  ;;  %v1267_v43 = vstv %s1266_s27 }
 0xd7d   : > { %vm1268_vm0 = vcmp.lt.s32.totalorder %v1267_v43, %v2281_v27 }
 0xd7e   : > { %v1038_v60 = vsel %vm1037_vm13, %v2405_v59, %v920_v28  ;;  %v1269_v47 = vsel %vm1268_vm0, 1, %v2077_v21 }
 0xd7f   : > { %1050 = vrot.lane.b32.xlu0 %v1038_v60, %s2076_s15  ;;  %v393_v61 = vpop.permute.xlu1 %392 }
 0xd80   : > { %v420_v62 = vmul.f32 %v2268_v17, %v393_v61 }
 0xd82   : > { %v435_v63 = vadd.f32 %v2273_v18, %v420_v62 }
 0xd84   : > { %443 = vst [vmem:[#allocation2 + $0xa] sm:$0x3] %v435_v63  ;;  %v403_v63 = vsub.s32 7, %v2237_v10 }
 0xd8b   : > { %v1048_v1 = vld [vmem:[#allocation2 + $0xa] sm:$0x3] }
 0xdf1   : > { %v1051_v0 = vpop.permute.xlu0 %1050 }
 0xdf2   : > { %1718 = vmatmul.mubr.msk.f32.vlgmr.msra.gmra.mrb[4].mxu1 %vm454_vm3, %v1051_v0  ;;  %v404_v0 = vrot.slane %v2246_v13, %v403_v63 }
 0xdf3   : > { %1786 = vmatpush3.bf16.msra.mxu1 %v2230_v7  ;;  %1739 = vmatprep.mubr.msk.f32.mxu1 %vm2074_vm2, %v2075_v9  ;;  %v1151_v7 = vsel %vm1150_vm14, 1, %v2077_v21 }
 0xdf4   : > { %1787 = vmatprep.subr.bf16.mxu1 %v2073_v6 }
 0xdf7   : > { %1789 = vmatpush3.bf16.msra.mxu1 %v2243_v12 }
 0xec5   : > { %v1120_v2 = vpop.f32.mrb[4].mxu1 }
 0xec6   : > { %v1121_v3 = vadd.f32 %v1120_v2, %v1048_v1  ;;  %v1719_v4 = vpop.f32.mrb[5].mxu1 }
 0xec8   : > { %1911 = vtanh.f32 %v1121_v3  ;;  %v1596_v9 = vmul.f32 -1.442695, %v1121_v3 }
 0xeca   : > { %1913 = vpow2.f32 %v1596_v9 }
 0xed2   : > { %v1912_v8 = vpop.eup %1911 }
 0xed3   : > { %1133 = vrot.lane.b32.xlu0 %v1912_v8, %s2078_s24 }
 0xed4   : > { %v1914_v6 = vpop.eup %1913 }
 0xed5   : > { %v1127_v11 = vadd.f32 1.0, %v1914_v6 }
 0xed7   : > { %1153 = vperm.xlu0 %1870, %v1151_v7   ;;  %1915 = vrcp.f32 %v1127_v11 }
 0xee1   : > { %v1916_v12 = vpop.eup %1915 }
 0xee2   : > { %v1131_v22 = vmul.f32 %v1916_v12, %v1039_v20 }
 0xf45   : > { %v1134_v14 = vpop.permute.xlu0 %1133 }
 0xf46   : > { %v1136_v16 = vmul.f32 %v1916_v12, %v1134_v14 }
 0xf48   : > { %1138 = vrot.lane.b32.xlu1 %v1136_v16, %s2076_s15  ;;  %v804_v16 = vsel %vm801_vm9, %v2350_v51, 0.0 }
 0xf56   : > { %v2430_v31 = vpop.permute.xlu0 %1153 }
 0xf57   : > { %vm1155_vm15 = vcmp.eq.s32.totalorder %v2430_v31, 1 }
 0xfba   : > { %v1139_v23 = vpop.permute.xlu1 %1138 }
 0xfbb   : > { %v1141_v25 = vadd.f32 %v1139_v23, %v1131_v22 }
 0xfbd   : > { %1917 = vtanh.f32 %v1141_v25  ;;  %v1157_v56 = vsel %vm1155_vm15, %v1141_v25, %v1039_v20 }
 0xfc7   : > { %v1918_v28 = vpop.eup %1917 }
 0xfc8   : > { %1144 = vrot.lane.b32.xlu1 %v1918_v28, %s2078_s24 }
 0xfcc   : > { %399 = vbcast.lane.b32.xlu1 %v397_v30, 256 }
0x103a   : > { %v1145_v32 = vpop.permute.xlu1 %1144 }
0x103b   : > { %v2432_v33 = vmul.f32 %v1916_v12, %v1145_v32  ;;  %v1385_v12 = vstv %s1384_s0 }
0x103c   : > { %vm1386_vm2 = vcmp.lt.s32.totalorder %v1385_v12, %v2281_v27  ;;  %v1040_v27 = vsel %vm1037_vm13, %v2405_v59, 0.0 }
0x103d   : > { %v1156_v34 = vsel %vm1155_vm15, %v2432_v33, %v1038_v60 }
0x103e   : > { %1168 = vrot.lane.b32.xlu0 %v1156_v34, %s2076_s15  ;;  %v400_v35 = vpop.permute.xlu1 %399 }
0x103f   : > { %v421_v36 = vmul.f32 %v2268_v17, %v400_v35 }
0x1041   : > { %v436_v37 = vadd.f32 %v2273_v18, %v421_v36 }
0x1043   : > { %444 = vst [vmem:[#allocation2 + $0xc] sm:$0x3] %v436_v37  ;;  %v686_v37 = vsel %vm683_vm7, %v2322_v19, 0.0 }
0x104a   : > { %v1166_v39 = vld [vmem:[#allocation2 + $0xc] sm:$0x3] }
0x10b0   : > { %v1169_v38 = vpop.permute.xlu0 %1168 }
0x10b1   : > { %1729 = vmatmul.mubr.msk.f32.vlgmr.msra.gmra.mrb[6].mxu0 %vm454_vm3, %v1169_v38  ;;  %v922_v38 = vsel %vm919_vm11, %v2378_v26, 0.0 }
0x1184   : > { %v1238_v40 = vpop.f32.mrb[6].mxu0 }
0x1185   : > { %v1239_v41 = vadd.f32 %v1238_v40, %v1166_v39  ;;  %v1730_v42 = vpop.f32.mrb[7].mxu0  ;;  %v1158_v39 = vsel %vm1155_vm15, %v2432_v33, 0.0 }
0x1187   : > { %1919 = vtanh.f32 %v1239_v41  ;;  %v1599_v48 = vmul.f32 -1.442695, %v1239_v41 }
0x1189   : > { %1921 = vpow2.f32 %v1599_v48 }
0x1191   : > { %v1920_v44 = vpop.eup %1919 }
0x1192   : > { %1251 = vrot.lane.b32.xlu0 %v1920_v44, %s2078_s24 }
0x1193   : > { %v1922_v50 = vpop.eup %1921 }
0x1194   : > { %v1245_v52 = vadd.f32 1.0, %v1922_v50 }
0x1196   : > { %1271 = vperm.xlu0 %1870, %v1269_v47   ;;  %1923 = vrcp.f32 %v1245_v52 }
0x11a0   : > { %v1924_v53 = vpop.eup %1923 }
0x11a1   : > { %v1249_v58 = vmul.f32 %v1924_v53, %v1157_v56 }
0x1204   : > { %v1252_v54 = vpop.permute.xlu0 %1251 }
0x1205   : > { %v1254_v55 = vmul.f32 %v1924_v53, %v1252_v54 }
0x1207   : > { %1256 = vrot.lane.b32.xlu1 %v1254_v55, %s2076_s15 }
0x1215   : > { %v1272_v1 = vpop.permute.xlu0 %1271 }
0x1216   : > { %vm1273_vm1 = vcmp.eq.s32.totalorder %v1272_v1, 1 }
0x1279   : > { %v1257_v60 = vpop.permute.xlu1 %1256 }
0x127a   : > { %v1259_v61 = vadd.f32 %v1257_v60, %v1249_v58 }
0x127c   : > { %1925 = vtanh.f32 %v1259_v61  ;;  %v1275_v29 = vsel %vm1273_vm1, %v1259_v61, %v1157_v56 }
0x1286   : > { %v1926_v62 = vpop.eup %1925 }
0x1287   : > { %1262 = vrot.lane.b32.xlu1 %v1926_v62, %s2078_s24 }
0x128b   : > { %406 = vbcast.lane.b32.xlu1 %v404_v0, 256 }
0x12f9   : > { %v1263_v2 = vpop.permute.xlu1 %1262 }
0x12fa   : > { %v1265_v3 = vmul.f32 %v1924_v53, %v1263_v2 }
0x12fc   : > { %v2453_v4 = vsel %vm1273_vm1, %v1265_v3, %v1156_v34 }
0x12fd   : > { %1286 = vrot.lane.b32.xlu0 %v2453_v4, %s2076_s15  ;;  %v407_v5 = vpop.permute.xlu1 %406 }
0x12fe   : > { %v422_v8 = vmul.f32 %v2268_v17, %v407_v5  ;;  %v1387_v17 = vsel %vm1386_vm2, 1, %v2077_v21  ;;  %v1276_v21 = vsel %vm1273_vm1, %v1265_v3, 0.0 }
0x1300   : > { %v437_v7 = vadd.f32 %v2273_v18, %v422_v8  ;;  %v568_v18 = vsel %vm562_vm5, %v2294_v46, 0.0 }
0x1302   : > { %445 = vst [vmem:[#allocation2 + $0xe] sm:$0x3] %v437_v7 }
0x1309   : > { %v1284_v13 = vld [vmem:[#allocation2 + $0xe] sm:$0x3] }
0x136f   : > { %v1287_v10 = vpop.permute.xlu0 %1286 }
0x1370   : > { %1740 = vmatmul.mubr.msk.f32.vlgmr.msra.gmra.mrb[6].mxu1 %vm454_vm3, %v1287_v10  ;;  %vm573_vm3 = vcmask 254976  }
0x1443   : > { %v1356_v9 = vpop.f32.mrb[6].mxu1 }
0x1444   : > { %v1357_v6 = vadd.f32 %v1356_v9, %v1284_v13  ;;  %v1741_v11 = vpop.f32.mrb[7].mxu1 }
0x1446   : > { %1927 = vtanh.f32 %v1357_v6  ;;  %v1602_v45 = vmul.f32 -1.442695, %v1357_v6 }
0x1448   : > { %1929 = vpow2.f32 %v1602_v45 }
0x1450   : > { %v1928_v14 = vpop.eup %1927 }
0x1451   : > { %1369 = vrot.lane.b32.xlu0 %v1928_v14, %s2078_s24 }
0x1452   : > { %v1930_v46 = vpop.eup %1929 }
0x1453   : > { %v1363_v49 = vadd.f32 1.0, %v1930_v46 }
0x1455   : > { %1389 = vperm.xlu0 %1870, %v1387_v17   ;;  %1931 = vrcp.f32 %v1363_v49 }
0x1459   : > { %570 = vrot.lane.b32.xlu0 %v568_v18, %s2076_s15 }
0x145d   : > { %806 = vrot.lane.b32.xlu0 %v804_v16, %s2076_s15 }
0x145f   : > { %v1932_v51 = vpop.eup %1931 }
0x1460   : > { %v1367_v30 = vmul.f32 %v1932_v51, %v1275_v29 }
0x1461   : > { %1042 = vrot.lane.b32.xlu0 %v1040_v27, %s2076_s15 }
0x1465   : > { %1278 = vrot.lane.b32.xlu0 %v1276_v21, %s2076_s15 }
0x14c3   : > { %v1370_v20 = vpop.permute.xlu0 %1369 }
0x14c4   : > { %v1372_v22 = vmul.f32 %v1932_v51, %v1370_v20 }
0x14c6   : > { %1374 = vrot.lane.b32.xlu1 %v1372_v22, %s2076_s15 }
0x14d4   : > { %v1390_v57 = vpop.permute.xlu0 %1389 }
0x14d5   : > { %vm1391_vm4 = vcmp.eq.s32.totalorder %v1390_v57, 1 }
0x14d8   : > { %v571_v59 = vpop.permute.xlu0 %570 }
0x14d9   : > { %574 = vst.msk [vmem:[%s2207_s13] sm:$0x3] %vm573_vm3, %v571_v59 }
0x14dc   : > { %v807_v23 = vpop.permute.xlu0 %806 }
0x14dd   : > { %1588 = vst.msk [vmem:[%s2207_s13 + $0x4] sm:$0x3] %vm573_vm3, %v807_v23 }
0x14e0   : > { %v1043_v25 = vpop.permute.xlu0 %1042 }
0x14e1   : > { %1594 = vst.msk [vmem:[%s2207_s13 + $0x8] sm:$0x3] %vm573_vm3, %v1043_v25 }
0x14e4   : > { %v1279_v28 = vpop.permute.xlu0 %1278 }
0x14e5   : > { %1600 = vst.msk [vmem:[%s2207_s13 + $0xc] sm:$0x3] %vm573_vm3, %v1279_v28 }
0x1538   : > { %v1375_v32 = vpop.permute.xlu1 %1374 }
0x1539   : > { %v1377_v34 = vadd.f32 %v1375_v32, %v1367_v30 }
0x153b   : > { %1933 = vtanh.f32 %v1377_v34  ;;  %v1393_v35 = vsel %vm1391_vm4, %v1377_v34, %v1275_v29 }
0x1545   : > { %v1934_v36 = vpop.eup %1933 }
0x1546   : > { %1380 = vrot.lane.b32.xlu1 %v1934_v36, %s2078_s24 }
0x154a   : > { %688 = vrot.lane.b32.xlu1 %v686_v37, %s2076_s15 }
0x154e   : > { %924 = vrot.lane.b32.xlu1 %v922_v38, %s2076_s15 }
0x1552   : > { %1160 = vrot.lane.b32.xlu1 %v1158_v39, %s2076_s15 }
0x15b8   : > { %v1381_v40 = vpop.permute.xlu1 %1380 }
0x15b9   : > { %v1383_v15 = vmul.f32 %v1932_v51, %v1381_v40 }
0x15bb   : > { %v1394_v19 = vsel %vm1391_vm4, %v1383_v15, 0.0  ;;  %v1392_v41 = vsel %vm1391_vm4, %v1383_v15, %v2453_v4 }
0x15bc   : > { %1396 = vrot.lane.b32.xlu1 %v1394_v19, %s2076_s15  ;;  %1402 = vrot.lane.b32.xlu0 %v1392_v41, %s2076_s15  ;;  %v689_v24 = vpop.permute.xlu1 %688 }
0x15bd   : > { %1585 = vst.msk [vmem:[%s2207_s13 + $0x2] sm:$0x3] %vm573_vm3, %v689_v24 }
0x15c0   : > { %1407 = vrot.lane.b32.xlu1 %v1393_v35, %s2079_s28  ;;  %v925_v26 = vpop.permute.xlu1 %924 }
0x15c1   : > { %1591 = vst.msk [vmem:[%s2207_s13 + $0x6] sm:$0x3] %vm573_vm3, %v925_v26 }
0x15c4   : > { %v1161_v31 = vpop.permute.xlu1 %1160 }
0x15c5   : > { %1597 = vst.msk [vmem:[%s2207_s13 + $0xa] sm:$0x3] %vm573_vm3, %v1161_v31 }
0x162e   : > { %v1403_v33 = vpop.permute.xlu0 %1402  ;;  %v1397_v42 = vpop.permute.xlu1 %1396 }
0x162f   : > { %1405 = vst.msk [vmem:[#allocation7] sm:$0x3] %vm573_vm3, %v1403_v33  ;;  %1603 = vst.msk [vmem:[%s2207_s13 + $0xe] sm:$0x3] %vm573_vm3, %v1397_v42 }
0x1632   : > { %v1408_v43 = vpop.permute.xlu1 %1407 }
0x1633   : > { %1410 = vst.msk [vmem:[#allocation9] sm:$0x3] %vm573_vm3, %v1408_v43 }
0x1634 PF: > { %s2080_s23 = smov [#allocation7]   ;;  %s1613_s24 = sshll.u32 %s2061_s10, 8 }
0x1635   : > { %s1442_s15 = sshll.u32 %s2080_s23, 4  ;;  %s1443_s15 = int_to_ptr.vmem [resolvable:$true] %s1442_s15 }
0x1636   : > { %s1935_s28 = scalar_lea.vmem %s1443_s15, 32  ;;  %p1942_p6 = scmp.lt.s32.totalorder %s1443_s15, %s1443_s15 }
0x1637   : > { %p1936_p1 = scmp.ne.s32.totalorder %s1443_s15, %s1935_s28  ;;  %p1943_p7 = scmp.lt.s32.totalorder %s1935_s28, %s1935_s28 }
0x1639   : > { %p1937_p3 = pnand %p1936_p1, %p2169_p2  ;;  %p1944_p9 = por %p1943_p7, %p1942_p6 }
0x163b   : > { %p1938_p5 = pneg %p1937_p3 }
0x163d   : > { %p1945_p10 = pnand %p1944_p9, %p1938_p5 }
0x163f   : > { %1948 = shalt.err (!%p1945_p10)
}
0x1640   : > { %s1949_s25 = scalar_lea.hbm %s2619_s7, 32 }
0x1641   : > { %p1950_p11 = scmp.ne.s32.totalorder %s2619_s7, %s1949_s25  ;;  %p1955_p0 = scmp.lt.u32.totalorder %s1949_s25, %s2619_s7 }
0x1643   : > { %p1951_p12 = pnand %p1950_p11, %p2169_p2 }
0x1645   : > { %p1952_p13 = pneg %p1951_p12 }
0x1647   : > { %p1957_p1 = pnand %p1955_p0, %p1952_p13 }
0x1649   : > { %1960 = shalt.err (!%p1957_p1)
}
0x164a   : > { %1792 = dma.vmem_to_hbm [thread:$0]  (%p2169_p2), %s1443_s15, 32, %s2619_s7, [#allocation8]  }
0x164b   : > { %s2537_s26 = scalar_lea.hbm %s2618_s6, %s1613_s24  ;;  %s1426_s27 = sshll.u32 %s2207_s13, 4  ;;  %s2540_s27 = int_to_ptr.vmem [resolvable:$true] %s1426_s27 }
0x164c   : > { %s2544_s25 = scalar_lea.sflag [#allocation6], %s306_s21  ;;  %s1961_s10 = scalar_lea.vmem %s2540_s27, 256 }
0x164d   : > { %p1962_p3 = scmp.ne.s32.totalorder %s2540_s27, %s1961_s10  ;;  %s2081_s15 = smov [#allocation5]  }
0x164e   : > { %s1965_s0 = sshll.u32 %s2081_s15, 4  ;;  %s1966_s0 = int_to_ptr.vmem [resolvable:$false] %s1965_s0 }
0x164f   : > { %p1963_p5 = pnand %p1962_p3, %p2179_p4  ;;  %s1967_s23 = scalar_lea.vmem %s1966_s0, 512 }
0x1650   : > { %p1968_p7 = scmp.lt.s32.totalorder %s2540_s27, %s1966_s0  ;;  %p1969_p9 = scmp.lt.s32.totalorder %s1967_s23, %s1961_s10 }
0x1651   : > { %p1964_p6 = pneg %p1963_p5 }
0x1652   : > { %p1970_p10 = por %p1969_p9, %p1968_p7 }
0x1654   : > { %p1971_p11 = pnand %p1970_p10, %p1964_p6 }
0x1656   : > { %1974 = shalt.err (!%p1971_p11)
}
0x1657   : > { %s1975_s21 = scalar_lea.hbm %s2537_s26, 256  ;;  %s1979_s28 = scalar_lea.hbm %s2618_s6, 768 }
0x1658   : > { %p1976_p12 = scmp.ne.s32.totalorder %s2537_s26, %s1975_s21  ;;  %p1980_p1 = scmp.lt.u32.totalorder %s2537_s26, %s2618_s6 }
0x1659   : > { %p1981_p3 = scmp.lt.u32.totalorder %s1979_s28, %s1975_s21  ;;  %p1983_p6 = scmp.lt.u32.totalorder %s1975_s21, %s2537_s26 }
0x165a   : > { %p1977_p13 = pnand %p1976_p12, %p2179_p4 }
0x165b   : > { %p1982_p5 = por %p1981_p3, %p1980_p1 }
0x165c   : > { %p1978_p0 = pneg %p1977_p13 }
0x165d   : > { %p1984_p7 = por %p1983_p6, %p1982_p5 }
0x165f   : > { %p1985_p9 = pnand %p1984_p7, %p1978_p0 }
0x1661   : > { %1988 = shalt.err (!%p1985_p9)
}
0x1662   : > { %s2082_s10 = smov 32   ;;  %s2083_s15 = smov 2  }
0x1663   : > { %1790 = dma.vmem_to_hbm [thread:$0]  (%p2179_p4), %s2540_s27, 256, %s2537_s26, %s2544_s25, %s2082_s10, %s2082_s10, %s2083_s15  }
0x1664   : > { %s2084_s0 = smov [#allocation9]  }
0x1665   : > { %s1455_s23 = sshll.u32 %s2084_s0, 4  ;;  %s1456_s23 = int_to_ptr.vmem [resolvable:$true] %s1455_s23 }
0x1666   : > { %s1989_s13 = scalar_lea.vmem %s1456_s23, 32  ;;  %p1996_p13 = scmp.lt.s32.totalorder %s1456_s23, %s1456_s23 }
0x1667   : > { %p1990_p10 = scmp.ne.s32.totalorder %s1456_s23, %s1989_s13  ;;  %p1997_p0 = scmp.lt.s32.totalorder %s1989_s13, %s1989_s13 }
0x1669   : > { %p1991_p11 = pnand %p1990_p10, %p2169_p2  ;;  %p1998_p1 = por %p1997_p0, %p1996_p13 }
0x166b   : > { %p1992_p12 = pneg %p1991_p11 }
0x166d   : > { %p1999_p3 = pnand %p1998_p1, %p1992_p12 }
0x166f   : > { %2002 = shalt.err (!%p1999_p3)
}
0x1670   : > { %s2003_s28 = scalar_lea.hbm %s2620_s8, 32 }
0x1671   : > { %p2004_p4 = scmp.ne.s32.totalorder %s2620_s8, %s2003_s28  ;;  %p2009_p7 = scmp.lt.u32.totalorder %s2003_s28, %s2620_s8 }
0x1673   : > { %p2005_p5 = pnand %p2004_p4, %p2169_p2 }
0x1675   : > { %p2006_p6 = pneg %p2005_p5 }
0x1677   : > { %p2011_p9 = pnand %p2009_p7, %p2006_p6 }
0x1679   : > { %2014 = shalt.err (!%p2011_p9)
}
0x167a   : > { %1794 = dma.vmem_to_hbm [thread:$0]  (%p2169_p2), %s1456_s23, 32, %s2620_s8, [#allocation8]  }
0x167b   : > { %2040 = dma.done.wait (%p2169_p2), [#allocation8], 64  }
0x167c   : > { %2042 = vsyncadd (%p2169_p2), [#allocation8], 4294967232 }
0x167d PF: > { %p1808_p10 = scmp.ge.s32.totalorder %s2069_s12, 2  ;;  %s1475_s10 = sand.u32 1, %s2049_s29  }
0x167e   : > { %s1476_s15 = scalar_lea.sflag [#allocation6], %s1475_s10 }
0x167f   : > { %p1801_p11 = pnand %p1808_p10, %p2186_p8 }
0x1681   : > { %2044 = dma.done.wait (!%p1801_p11), %s1476_s15, 256  }
0x1682   : > { %2046 = vsyncadd (!%p1801_p11), %s1476_s15, 4294967040  ;;  %s24_s12 = sadd.s32 1, %s2069_s12   ;;  %s2624_s29 = smov %s2053_s30 }
0x1683   : > { %p21_p12 = scmp.ge.s32.totalorder %s24_s12, 5   ;;  %s2625_s30 = smov %s2057_s9 }
0x1684   : > { %s2626_s9 = smov %s2192_s20  ;;  %s2627_s10 = smov %s2065_s11 }
0x1685   : > { %s2628_s11 = smov %s2630_s14  ;;  %23 = sbr.rel (!%p21_p12) target bundleno = 7 (0x7), region = 122 }
0x168c   :  { %1481 = vsyncpa [#allocation6], 1 }
0x168d   :  { %1483 = vsyncpa [#allocation6 + $0x1], 1 }
0x168e   :  { %1484 = vsyncpa [#allocation8], 1 }

</bundles_post_ra>
